<compile_context>
chip_gen: v7x
topology: tpu7x:2x2x1
jax: 0.10.0
libtpu: 0.0.40
codegen_flags: <defaults>
</compile_context>

<pallas_src>
import jax
import jax.numpy as jnp
import numpy as np
from jax import lax
from jax.experimental import pallas as pl
from jax.experimental.pallas import tpu as pltpu


def _pack_blocks(named_blocks, ncols):
    """Stack 2-D f32 blocks into one (rows, ncols) buffer.

    Each block is zero-padded to `ncols` columns and to a multiple of 8 rows so
    every in-kernel slice starts on a sublane-aligned offset.  Returns the
    packed array and {name: start_row}.
    """
    parts, offsets, row = [], {}, 0
    for name, arr in named_blocks:
        h, w = arr.shape
        pad_r = (-h) % 8
        a = jnp.pad(arr.astype(jnp.float32), ((0, pad_r), (0, ncols - w)))
        offsets[name] = row
        parts.append(a)
        row += h + pad_r
    return jnp.concatenate(parts, axis=0), offsets


def decoder_forward(x_enc, y_prev, params):
    """y_pred (B, 1) for the DA-RNN decoder; the whole recurrence in one kernel."""
    B, Tm1, E = x_enc.shape
    D = params["lstm_whh"].shape[1]
    BE = B * E
    NC = max(BE, 4 * D)
    f32 = jnp.float32

    # ---- re-layout PyTorch-shaped weights (out, in) -> (in, out) ------------
    attn_w1 = params["attn_w1"].astype(f32)                  # (E, 2D+E)
    w1dc = attn_w1[:, :2 * D].T                              # (2D, E)
    w1x = attn_w1[:, 2 * D:].T                               # (E, E)
    b1 = params["attn_b1"].astype(f32).reshape(1, E)
    w2 = params["attn_w2"].astype(f32).reshape(E)            # attn_b2 dropped (softmax shift-invariant)

    wih = params["lstm_wih"].astype(f32).T                   # (1, 4D)
    whh = params["lstm_whh"].astype(f32).T                   # (D, 4D)
    blstm = (params["lstm_bih"] + params["lstm_bhh"]).astype(f32).reshape(1, 4 * D)

    # Fold fc (Linear(E+1 -> 1)) into the LSTM input weights (exact algebra).
    fc_wc = params["fc_w"][:, :E].astype(f32).T              # (E, 1)
    fc_wy = params["fc_w"][0, E].astype(f32)                 # scalar
    fc_b = params["fc_b"][0].astype(f32)                     # scalar
    wih_c = fc_wc @ wih                                      # (E, 4D)
    wih_y = fc_wy * wih                                      # (1, 4D)
    blstm_f = blstm + fc_b * wih                             # (1, 4D)

    wf = params["fc_final_w"].astype(f32)                    # (1, D+E)
    wfb = params["fc_final_b"].astype(f32).reshape(1, 1)

    # Dropping the softmax max-shift is safe: hidden = tanh(.) is in [-1, 1],
    # so |score| <= ||w2||_1, far from exp() overflow.
    assert float(jnp.sum(jnp.abs(w2))) < 80.0, "attn w2 too large to skip softmax max-shift"

    # ---- batch-packed (lane-dense) constants --------------------------------
    eyeB = jnp.eye(B, dtype=f32)
    w1x_big = jnp.kron(eyeB, w1x)                            # (BE, BE) block-diag
    b1_row = jnp.tile(b1, (1, B))                            # (1, BE)
    w1dc_wide = jnp.tile(w1dc, (1, B))                       # (2D, BE)
    mask = jnp.kron(eyeB, jnp.ones((1, E), f32))             # (B, BE) 0/1 block mask
    w2_sel = jnp.kron(eyeB, w2.reshape(E, 1))                # (BE, B) block-diag selector
    gate_w = jnp.concatenate(
        [jnp.tile(wih_c, (B, 1)),                            # ctx rows   (BE, 4D)
         wih_y,                                              # y row      (1, 4D)
         blstm_f,                                            # bias row   (1, 4D)
         whh], axis=0)                                       # d rows     (D, 4D)
    wfd = wf[:, :D]                                          # (1, D)
    wfc = jnp.tile(wf[:, D:], (1, B))                        # (1, BE)

    pack, off = _pack_blocks(
        [("w1x_big", w1x_big), ("b1_row", b1_row), ("w1dc", w1dc_wide),
         ("mask", mask), ("w2_sel", w2_sel), ("gate", gate_w),
         ("wfd", wfd), ("wfc", wfc), ("wfb", wfb)], NC)

    # Lane-dense data layouts: x_enc as (T-1, B*E), y_prev as (T-1, B, 1).
    x_enc_r = jnp.transpose(x_enc.astype(f32), (1, 0, 2)).reshape(Tm1, BE)
    y_prev_t = jnp.transpose(y_prev.astype(f32), (1, 0)).reshape(Tm1, B, 1)

    def kernel(x_ref, y_ref, pk_ref, out_ref):
        # ---------------- loop-invariant precompute (hoisted) ----------------
        x_r = x_ref[...]                                                 # (T-1, BE)
        msk = pk_ref[off["mask"]:off["mask"] + B, :BE]                   # (B, BE)
        w1xb = pk_ref[off["w1x_big"]:off["w1x_big"] + BE, :BE]           # (BE, BE)
        b1r = pk_ref[off["b1_row"]:off["b1_row"] + 1, :BE]               # (1, BE)
        # X_encoed contribution to the first attention layer, batch-packed.
        x_part = jnp.dot(x_r, w1xb, preferred_element_type=jnp.float32) + b1r
        ones_col = jnp.ones((B, 1), jnp.float32)

        def step(t, carry):
            d_n, c_n, _ = carry
            # --- attention: tanh([d;c;X] @ W1 + b1) . w2, softmax over the T-1 steps
            dc = jnp.concatenate([d_n, c_n], axis=1)                     # (B, 2D)
            w1dcw = pk_ref[off["w1dc"]:off["w1dc"] + 2 * D, :BE]         # (2D, BE)
            hdw = jnp.dot(dc, w1dcw, preferred_element_type=jnp.float32)  # (B, BE)
            hd_row = jnp.sum(hdw * msk, axis=0, keepdims=True)           # (1, BE)
            hidden = jnp.tanh(x_part + hd_row)                           # (T-1, BE): 1 EUP push
            w2s = pk_ref[off["w2_sel"]:off["w2_sel"] + BE, :B]           # (BE, B)
            scores = jnp.dot(hidden, w2s, preferred_element_type=jnp.float32)  # (T-1, B)
            e = jnp.exp(scores)                   # max-shift dropped (bounded, see wrapper)
            s = jnp.sum(e, axis=0, keepdims=True)                        # (1, B)
            beta = e * pl.reciprocal(s, approx=False)                    # (T-1, B)
            beta_big = jnp.dot(beta, msk, preferred_element_type=jnp.float32)  # (T-1, BE)
            ctx_row = jnp.sum(beta_big * x_r, axis=0, keepdims=True)     # (1, BE)
            ctx_be = ctx_row * msk                                       # (B, BE) block-masked

            # --- LSTM step: single merged gate matmul [ctx | y | 1 | d] @ gate_w
            y_t = y_ref[t]                                               # (B, 1)
            lhs = jnp.concatenate([ctx_be, y_t, ones_col, d_n], axis=1)  # (B, BE+2+D)
            gw = pk_ref[off["gate"]:off["gate"] + BE + 2 + D, :4 * D]    # (BE+2+D, 4D)
            gates = jnp.dot(lhs, gw, preferred_element_type=jnp.float32)  # (B, 4D)
            sig = jax.nn.sigmoid(gates)            # full-vreg EUP push (i, f, o)
            tng = jnp.tanh(gates)                  # full-vreg EUP push (g)
            i_g = sig[:, 0:D]                      # PyTorch gate order: i, f, g, o
            f_g = sig[:, D:2 * D]
            g_g = tng[:, 2 * D:3 * D]
            o_g = sig[:, 3 * D:4 * D]
            c_new = f_g * c_n + i_g * g_g
            d_new = o_g * jnp.tanh(c_new)
            return d_new, c_new, ctx_be

        d0 = jnp.zeros((B, D), jnp.float32)
        c0 = jnp.zeros((B, D), jnp.float32)
        ctx0 = jnp.zeros((B, BE), jnp.float32)
        d_n, _, ctx_be = lax.fori_loop(0, Tm1, step, (d0, c0, ctx0), unroll=True)

        # y_pred = fc_final([d_n[0], context]) as elementwise muls + lane reduces.
        wfd_r = pk_ref[off["wfd"]:off["wfd"] + 1, :D]                    # (1, D)
        wfc_r = pk_ref[off["wfc"]:off["wfc"] + 1, :BE]                   # (1, BE)
        wfb_r = pk_ref[off["wfb"]:off["wfb"] + 1, 0:1]                   # (1, 1)
        out_ref[...] = (jnp.sum(d_n * wfd_r, axis=-1, keepdims=True)
                        + jnp.sum(ctx_be * wfc_r, axis=-1, keepdims=True)
                        + wfb_r)

    vmem = pltpu.MemorySpace.VMEM
    return pl.pallas_call(
        kernel,
        out_shape=jax.ShapeDtypeStruct((B, 1), f32),
        in_specs=[pl.BlockSpec(memory_space=vmem)] * 3,
        out_specs=pl.BlockSpec(memory_space=vmem),
    )(x_enc_r, y_prev_t, pack)


def decoder_ref(x_enc, y_prev, params):
    """Pure-JAX reference following the PyTorch code structure."""
    B, Tm1, E = x_enc.shape
    D = params["lstm_whh"].shape[1]
    d_n = jnp.zeros((B, D), jnp.float32)
    c_n = jnp.zeros((B, D), jnp.float32)
    context = jnp.zeros((B, E), jnp.float32)
    for t in range(Tm1):
        x = jnp.concatenate([jnp.broadcast_to(d_n[:, None, :], (B, Tm1, D)),
                             jnp.broadcast_to(c_n[:, None, :], (B, Tm1, D)),
                             x_enc], axis=2)
        h = jnp.tanh(x.reshape(-1, 2 * D + E) @ params["attn_w1"].T + params["attn_b1"])
        sc = (h @ params["attn_w2"].T + params["attn_b2"]).reshape(B, Tm1)
        beta = jax.nn.softmax(sc, axis=1)
        context = jnp.einsum("bt,bte->be", beta, x_enc)
        y_tilde = (jnp.concatenate([context, y_prev[:, t:t + 1]], axis=1)
                   @ params["fc_w"].T + params["fc_b"])
        gates = (y_tilde @ params["lstm_wih"].T + params["lstm_bih"]
                 + d_n @ params["lstm_whh"].T + params["lstm_bhh"])
        i = jax.nn.sigmoid(gates[:, :D])
        f = jax.nn.sigmoid(gates[:, D:2 * D])
        g = jnp.tanh(gates[:, 2 * D:3 * D])
        o = jax.nn.sigmoid(gates[:, 3 * D:])
        c_n = f * c_n + i * g
        d_n = o * jnp.tanh(c_n)
    return (jnp.concatenate([d_n, context], axis=1) @ params["fc_final_w"].T
            + params["fc_final_b"])


if __name__ == "__main__":
    B, T, E, D = 4, 9, 32, 32          # batch, window, encoder_hidden, decoder_hidden
    Tm1 = T - 1

    key = jax.random.PRNGKey(0)
    ks = jax.random.split(key, 16)

    def nrm(k, shape, scale=0.1):
        return (scale * jax.random.normal(k, shape)).astype(jnp.float32)

    params = {
        "attn_w1": nrm(ks[0], (E, 2 * D + E)),
        "attn_b1": nrm(ks[1], (E,)),
        "attn_w2": nrm(ks[2], (1, E)),
        "attn_b2": nrm(ks[3], (1,)),
        "lstm_wih": nrm(ks[4], (4 * D, 1)),
        "lstm_whh": nrm(ks[5], (4 * D, D)),
        "lstm_bih": nrm(ks[6], (4 * D,)),
        "lstm_bhh": nrm(ks[7], (4 * D,)),
        "fc_w": nrm(ks[8], (1, E + 1), scale=1.0),   # fc.weight.data.normal_()
        "fc_b": nrm(ks[9], (1,)),
        "fc_final_w": nrm(ks[10], (1, D + E)),
        "fc_final_b": nrm(ks[11], (1,)),
    }

    x_enc = nrm(ks[12], (B, Tm1, E), scale=1.0)      # X_encoed
    y_prev = nrm(ks[13], (B, Tm1), scale=1.0)        # y_prev

    y = decoder_forward(x_enc, y_prev, params)
    y = jax.block_until_ready(y)

    y_ref = decoder_ref(x_enc, y_prev, params)
    assert y.shape == (B, 1)
    np.testing.assert_allclose(np.asarray(y), np.asarray(y_ref), rtol=2e-4, atol=2e-4)
    print("KERNEL_OK")
</pallas_src>

<mosaic_0001>
module attributes {stable_mosaic.version = 11 : i64} {
  func.func @kernel(%arg0: memref<8x128xf32, #tpu.memory_space<vmem>>, %arg1: memref<8x4x1xf32, #tpu.memory_space<vmem>>, %arg2: memref<528x128xf32, #tpu.memory_space<vmem>>, %arg3: memref<4x1xf32, #tpu.memory_space<vmem>>) attributes {dimension_semantics = [], scalar_prefetch = 0 : i64, scratch_operands = 0 : i64, tpu.core_type = #tpu.core_type<tc>} {
    %c0 = arith.constant 0 : index
    %c0_0 = arith.constant 0 : index
    %0 = vector.load %arg0[%c0, %c0_0] : memref<8x128xf32, #tpu.memory_space<vmem>>, vector<8x128xf32>
    %c200 = arith.constant 200 : index
    %c0_1 = arith.constant 0 : index
    %1 = vector.load %arg2[%c200, %c0_1] : memref<528x128xf32, #tpu.memory_space<vmem>>, vector<4x128xf32>
    %c0_2 = arith.constant 0 : index
    %c0_3 = arith.constant 0 : index
    %2 = vector.load %arg2[%c0_2, %c0_3] : memref<528x128xf32, #tpu.memory_space<vmem>>, vector<128x128xf32>
    %c128 = arith.constant 128 : index
    %c0_4 = arith.constant 0 : index
    %3 = vector.load %arg2[%c128, %c0_4] : memref<528x128xf32, #tpu.memory_space<vmem>>, vector<1x128xf32>
    %cst = arith.constant dense<0.000000e+00> : vector<8x128xf32>
    %4 = tpu.matmul %0, %2, %cst {dimension_numbers = #tpu.dot_dimension_numbers<[1], [0], [0], [1], [0, 0, 1, 1], [], []>} : vector<8x128xf32>, vector<128x128xf32>, vector<8x128xf32> -> vector<8x128xf32>
    %5 = vector.broadcast %3 : vector<1x128xf32> to vector<8x128xf32>
    %6 = arith.addf %4, %5 : vector<8x128xf32>
    %cst_5 = arith.constant 1.000000e+00 : f32
    %7 = vector.broadcast %cst_5 : f32 to vector<4x1xf32>
    %cst_6 = arith.constant 0.000000e+00 : f32
    %8 = vector.broadcast %cst_6 : f32 to vector<4x32xf32>
    %cst_7 = arith.constant 0.000000e+00 : f32
    %9 = vector.broadcast %cst_7 : f32 to vector<4x32xf32>
    %cst_8 = arith.constant 0.000000e+00 : f32
    %10 = vector.broadcast %cst_8 : f32 to vector<4x128xf32>
    %c0_i32 = arith.constant 0 : i32
    %11 = tpu.concatenate %8, %9 in 1 : vector<4x32xf32>, vector<4x32xf32> -> vector<4x64xf32>
    %c136 = arith.constant 136 : index
    %c0_9 = arith.constant 0 : index
    %12 = vector.load %arg2[%c136, %c0_9] : memref<528x128xf32, #tpu.memory_space<vmem>>, vector<64x128xf32>
    %cst_10 = arith.constant dense<0.000000e+00> : vector<4x128xf32>
    %13 = tpu.matmul %11, %12, %cst_10 {dimension_numbers = #tpu.dot_dimension_numbers<[1], [0], [0], [1], [0, 0, 1, 1], [], []>} : vector<4x64xf32>, vector<64x128xf32>, vector<4x128xf32> -> vector<4x128xf32>
    %14 = arith.mulf %13, %1 : vector<4x128xf32>
    %cst_11 = arith.constant dense<0.000000e+00> : vector<128xf32>
    %15 = vector.multi_reduction <add>, %14, %cst_11 [0] : vector<4x128xf32> to vector<128xf32>
    %16 = vector.shape_cast %15 : vector<128xf32> to vector<1x128xf32>
    %17 = vector.broadcast %16 : vector<1x128xf32> to vector<8x128xf32>
    %18 = arith.addf %6, %17 : vector<8x128xf32>
    %19 = math.tanh %18 : vector<8x128xf32>
    %c208 = arith.constant 208 : index
    %c0_12 = arith.constant 0 : index
    %20 = vector.load %arg2[%c208, %c0_12] : memref<528x128xf32, #tpu.memory_space<vmem>>, vector<128x4xf32>
    %cst_13 = arith.constant dense<0.000000e+00> : vector<8x4xf32>
    %21 = tpu.matmul %19, %20, %cst_13 {dimension_numbers = #tpu.dot_dimension_numbers<[1], [0], [0], [1], [0, 0, 1, 1], [], []>} : vector<8x128xf32>, vector<128x4xf32>, vector<8x4xf32> -> vector<8x4xf32>
    %22 = math.exp %21 : vector<8x4xf32>
    %cst_14 = arith.constant dense<0.000000e+00> : vector<4xf32>
    %23 = vector.multi_reduction <add>, %22, %cst_14 [0] : vector<8x4xf32> to vector<4xf32>
    %24 = vector.shape_cast %23 : vector<4xf32> to vector<1x4xf32>
    %25 = tpu.reciprocal %24 : vector<1x4xf32> -> vector<1x4xf32>
    %26 = vector.broadcast %25 : vector<1x4xf32> to vector<8x4xf32>
    %27 = arith.mulf %22, %26 : vector<8x4xf32>
    %cst_15 = arith.constant dense<0.000000e+00> : vector<8x128xf32>
    %28 = tpu.matmul %27, %1, %cst_15 {dimension_numbers = #tpu.dot_dimension_numbers<[1], [0], [0], [1], [0, 0, 1, 1], [], []>} : vector<8x4xf32>, vector<4x128xf32>, vector<8x128xf32> -> vector<8x128xf32>
    %29 = arith.mulf %28, %0 : vector<8x128xf32>
    %cst_16 = arith.constant dense<0.000000e+00> : vector<128xf32>
    %30 = vector.multi_reduction <add>, %29, %cst_16 [0] : vector<8x128xf32> to vector<128xf32>
    %31 = vector.shape_cast %30 : vector<128xf32> to vector<1x128xf32>
    %32 = vector.broadcast %31 : vector<1x128xf32> to vector<4x128xf32>
    %33 = arith.mulf %32, %1 : vector<4x128xf32>
    %34 = arith.index_cast %c0_i32 : i32 to index
    %c0_17 = arith.constant 0 : index
    %c0_18 = arith.constant 0 : index
    %35 = vector.load %arg1[%34, %c0_17, %c0_18] : memref<8x4x1xf32, #tpu.memory_space<vmem>>, vector<1x4x1xf32>
    %36 = vector.shape_cast %35 : vector<1x4x1xf32> to vector<4x1xf32>
    %37 = tpu.concatenate %33, %36, %7, %8 in 1 : vector<4x128xf32>, vector<4x1xf32>, vector<4x1xf32>, vector<4x32xf32> -> vector<4x162xf32>
    %c336 = arith.constant 336 : index
    %c0_19 = arith.constant 0 : index
    %38 = vector.load %arg2[%c336, %c0_19] : memref<528x128xf32, #tpu.memory_space<vmem>>, vector<162x128xf32>
    %cst_20 = arith.constant dense<0.000000e+00> : vector<4x128xf32>
    %39 = tpu.matmul %37, %38, %cst_20 {dimension_numbers = #tpu.dot_dimension_numbers<[1], [0], [0], [1], [0, 0, 1, 1], [], []>} : vector<4x162xf32>, vector<162x128xf32>, vector<4x128xf32> -> vector<4x128xf32>
    %40 = arith.negf %39 : vector<4x128xf32>
    %41 = math.exp %40 : vector<4x128xf32>
    %cst_21 = arith.constant 1.000000e+00 : f32
    %42 = vector.broadcast %cst_21 : f32 to vector<4x128xf32>
    %43 = arith.addf %42, %41 : vector<4x128xf32>
    %44 = arith.divf %42, %43 : vector<4x128xf32>
    %45 = math.tanh %39 : vector<4x128xf32>
    %46 = vector.extract_strided_slice %44 {offsets = [0, 0], sizes = [4, 32], strides = [1, 1]} : vector<4x128xf32> to vector<4x32xf32>
    %47 = vector.extract_strided_slice %44 {offsets = [0, 32], sizes = [4, 32], strides = [1, 1]} : vector<4x128xf32> to vector<4x32xf32>
    %48 = vector.extract_strided_slice %45 {offsets = [0, 64], sizes = [4, 32], strides = [1, 1]} : vector<4x128xf32> to vector<4x32xf32>
    %49 = vector.extract_strided_slice %44 {offsets = [0, 96], sizes = [4, 32], strides = [1, 1]} : vector<4x128xf32> to vector<4x32xf32>
    %50 = arith.mulf %47, %9 : vector<4x32xf32>
    %51 = arith.mulf %46, %48 : vector<4x32xf32>
    %52 = arith.addf %50, %51 : vector<4x32xf32>
    %53 = math.tanh %52 : vector<4x32xf32>
    %54 = arith.mulf %49, %53 : vector<4x32xf32>
    %c1_i32 = arith.constant 1 : i32
    %55 = tpu.concatenate %54, %52 in 1 : vector<4x32xf32>, vector<4x32xf32> -> vector<4x64xf32>
    %c136_22 = arith.constant 136 : index
    %c0_23 = arith.constant 0 : index
    %56 = vector.load %arg2[%c136_22, %c0_23] : memref<528x128xf32, #tpu.memory_space<vmem>>, vector<64x128xf32>
    %cst_24 = arith.constant dense<0.000000e+00> : vector<4x128xf32>
    %57 = tpu.matmul %55, %56, %cst_24 {dimension_numbers = #tpu.dot_dimension_numbers<[1], [0], [0], [1], [0, 0, 1, 1], [], []>} : vector<4x64xf32>, vector<64x128xf32>, vector<4x128xf32> -> vector<4x128xf32>
    %58 = arith.mulf %57, %1 : vector<4x128xf32>
    %cst_25 = arith.constant dense<0.000000e+00> : vector<128xf32>
    %59 = vector.multi_reduction <add>, %58, %cst_25 [0] : vector<4x128xf32> to vector<128xf32>
    %60 = vector.shape_cast %59 : vector<128xf32> to vector<1x128xf32>
    %61 = vector.broadcast %60 : vector<1x128xf32> to vector<8x128xf32>
    %62 = arith.addf %6, %61 : vector<8x128xf32>
    %63 = math.tanh %62 : vector<8x128xf32>
    %c208_26 = arith.constant 208 : index
    %c0_27 = arith.constant 0 : index
    %64 = vector.load %arg2[%c208_26, %c0_27] : memref<528x128xf32, #tpu.memory_space<vmem>>, vector<128x4xf32>
    %cst_28 = arith.constant dense<0.000000e+00> : vector<8x4xf32>
    %65 = tpu.matmul %63, %64, %cst_28 {dimension_numbers = #tpu.dot_dimension_numbers<[1], [0], [0], [1], [0, 0, 1, 1], [], []>} : vector<8x128xf32>, vector<128x4xf32>, vector<8x4xf32> -> vector<8x4xf32>
    %66 = math.exp %65 : vector<8x4xf32>
    %cst_29 = arith.constant dense<0.000000e+00> : vector<4xf32>
    %67 = vector.multi_reduction <add>, %66, %cst_29 [0] : vector<8x4xf32> to vector<4xf32>
    %68 = vector.shape_cast %67 : vector<4xf32> to vector<1x4xf32>
    %69 = tpu.reciprocal %68 : vector<1x4xf32> -> vector<1x4xf32>
    %70 = vector.broadcast %69 : vector<1x4xf32> to vector<8x4xf32>
    %71 = arith.mulf %66, %70 : vector<8x4xf32>
    %cst_30 = arith.constant dense<0.000000e+00> : vector<8x128xf32>
    %72 = tpu.matmul %71, %1, %cst_30 {dimension_numbers = #tpu.dot_dimension_numbers<[1], [0], [0], [1], [0, 0, 1, 1], [], []>} : vector<8x4xf32>, vector<4x128xf32>, vector<8x128xf32> -> vector<8x128xf32>
    %73 = arith.mulf %72, %0 : vector<8x128xf32>
    %cst_31 = arith.constant dense<0.000000e+00> : vector<128xf32>
    %74 = vector.multi_reduction <add>, %73, %cst_31 [0] : vector<8x128xf32> to vector<128xf32>
    %75 = vector.shape_cast %74 : vector<128xf32> to vector<1x128xf32>
    %76 = vector.broadcast %75 : vector<1x128xf32> to vector<4x128xf32>
    %77 = arith.mulf %76, %1 : vector<4x128xf32>
    %78 = arith.index_cast %c1_i32 : i32 to index
    %c0_32 = arith.constant 0 : index
    %c0_33 = arith.constant 0 : index
    %79 = vector.load %arg1[%78, %c0_32, %c0_33] : memref<8x4x1xf32, #tpu.memory_space<vmem>>, vector<1x4x1xf32>
    %80 = vector.shape_cast %79 : vector<1x4x1xf32> to vector<4x1xf32>
    %81 = tpu.concatenate %77, %80, %7, %54 in 1 : vector<4x128xf32>, vector<4x1xf32>, vector<4x1xf32>, vector<4x32xf32> -> vector<4x162xf32>
    %c336_34 = arith.constant 336 : index
    %c0_35 = arith.constant 0 : index
    %82 = vector.load %arg2[%c336_34, %c0_35] : memref<528x128xf32, #tpu.memory_space<vmem>>, vector<162x128xf32>
    %cst_36 = arith.constant dense<0.000000e+00> : vector<4x128xf32>
    %83 = tpu.matmul %81, %82, %cst_36 {dimension_numbers = #tpu.dot_dimension_numbers<[1], [0], [0], [1], [0, 0, 1, 1], [], []>} : vector<4x162xf32>, vector<162x128xf32>, vector<4x128xf32> -> vector<4x128xf32>
    %84 = arith.negf %83 : vector<4x128xf32>
    %85 = math.exp %84 : vector<4x128xf32>
    %cst_37 = arith.constant 1.000000e+00 : f32
    %86 = vector.broadcast %cst_37 : f32 to vector<4x128xf32>
    %87 = arith.addf %86, %85 : vector<4x128xf32>
    %88 = arith.divf %86, %87 : vector<4x128xf32>
    %89 = math.tanh %83 : vector<4x128xf32>
    %90 = vector.extract_strided_slice %88 {offsets = [0, 0], sizes = [4, 32], strides = [1, 1]} : vector<4x128xf32> to vector<4x32xf32>
    %91 = vector.extract_strided_slice %88 {offsets = [0, 32], sizes = [4, 32], strides = [1, 1]} : vector<4x128xf32> to vector<4x32xf32>
    %92 = vector.extract_strided_slice %89 {offsets = [0, 64], sizes = [4, 32], strides = [1, 1]} : vector<4x128xf32> to vector<4x32xf32>
    %93 = vector.extract_strided_slice %88 {offsets = [0, 96], sizes = [4, 32], strides = [1, 1]} : vector<4x128xf32> to vector<4x32xf32>
    %94 = arith.mulf %91, %52 : vector<4x32xf32>
    %95 = arith.mulf %90, %92 : vector<4x32xf32>
    %96 = arith.addf %94, %95 : vector<4x32xf32>
    %97 = math.tanh %96 : vector<4x32xf32>
    %98 = arith.mulf %93, %97 : vector<4x32xf32>
    %c2_i32 = arith.constant 2 : i32
    %99 = tpu.concatenate %98, %96 in 1 : vector<4x32xf32>, vector<4x32xf32> -> vector<4x64xf32>
    %c136_38 = arith.constant 136 : index
    %c0_39 = arith.constant 0 : index
    %100 = vector.load %arg2[%c136_38, %c0_39] : memref<528x128xf32, #tpu.memory_space<vmem>>, vector<64x128xf32>
    %cst_40 = arith.constant dense<0.000000e+00> : vector<4x128xf32>
    %101 = tpu.matmul %99, %100, %cst_40 {dimension_numbers = #tpu.dot_dimension_numbers<[1], [0], [0], [1], [0, 0, 1, 1], [], []>} : vector<4x64xf32>, vector<64x128xf32>, vector<4x128xf32> -> vector<4x128xf32>
    %102 = arith.mulf %101, %1 : vector<4x128xf32>
    %cst_41 = arith.constant dense<0.000000e+00> : vector<128xf32>
    %103 = vector.multi_reduction <add>, %102, %cst_41 [0] : vector<4x128xf32> to vector<128xf32>
    %104 = vector.shape_cast %103 : vector<128xf32> to vector<1x128xf32>
    %105 = vector.broadcast %104 : vector<1x128xf32> to vector<8x128xf32>
    %106 = arith.addf %6, %105 : vector<8x128xf32>
    %107 = math.tanh %106 : vector<8x128xf32>
    %c208_42 = arith.constant 208 : index
    %c0_43 = arith.constant 0 : index
    %108 = vector.load %arg2[%c208_42, %c0_43] : memref<528x128xf32, #tpu.memory_space<vmem>>, vector<128x4xf32>
    %cst_44 = arith.constant dense<0.000000e+00> : vector<8x4xf32>
    %109 = tpu.matmul %107, %108, %cst_44 {dimension_numbers = #tpu.dot_dimension_numbers<[1], [0], [0], [1], [0, 0, 1, 1], [], []>} : vector<8x128xf32>, vector<128x4xf32>, vector<8x4xf32> -> vector<8x4xf32>
    %110 = math.exp %109 : vector<8x4xf32>
    %cst_45 = arith.constant dense<0.000000e+00> : vector<4xf32>
    %111 = vector.multi_reduction <add>, %110, %cst_45 [0] : vector<8x4xf32> to vector<4xf32>
    %112 = vector.shape_cast %111 : vector<4xf32> to vector<1x4xf32>
    %113 = tpu.reciprocal %112 : vector<1x4xf32> -> vector<1x4xf32>
    %114 = vector.broadcast %113 : vector<1x4xf32> to vector<8x4xf32>
    %115 = arith.mulf %110, %114 : vector<8x4xf32>
    %cst_46 = arith.constant dense<0.000000e+00> : vector<8x128xf32>
    %116 = tpu.matmul %115, %1, %cst_46 {dimension_numbers = #tpu.dot_dimension_numbers<[1], [0], [0], [1], [0, 0, 1, 1], [], []>} : vector<8x4xf32>, vector<4x128xf32>, vector<8x128xf32> -> vector<8x128xf32>
    %117 = arith.mulf %116, %0 : vector<8x128xf32>
    %cst_47 = arith.constant dense<0.000000e+00> : vector<128xf32>
    %118 = vector.multi_reduction <add>, %117, %cst_47 [0] : vector<8x128xf32> to vector<128xf32>
    %119 = vector.shape_cast %118 : vector<128xf32> to vector<1x128xf32>
    %120 = vector.broadcast %119 : vector<1x128xf32> to vector<4x128xf32>
    %121 = arith.mulf %120, %1 : vector<4x128xf32>
    %122 = arith.index_cast %c2_i32 : i32 to index
    %c0_48 = arith.constant 0 : index
    %c0_49 = arith.constant 0 : index
    %123 = vector.load %arg1[%122, %c0_48, %c0_49] : memref<8x4x1xf32, #tpu.memory_space<vmem>>, vector<1x4x1xf32>
    %124 = vector.shape_cast %123 : vector<1x4x1xf32> to vector<4x1xf32>
    %125 = tpu.concatenate %121, %124, %7, %98 in 1 : vector<4x128xf32>, vector<4x1xf32>, vector<4x1xf32>, vector<4x32xf32> -> vector<4x162xf32>
    %c336_50 = arith.constant 336 : index
    %c0_51 = arith.constant 0 : index
    %126 = vector.load %arg2[%c336_50, %c0_51] : memref<528x128xf32, #tpu.memory_space<vmem>>, vector<162x128xf32>
    %cst_52 = arith.constant dense<0.000000e+00> : vector<4x128xf32>
    %127 = tpu.matmul %125, %126, %cst_52 {dimension_numbers = #tpu.dot_dimension_numbers<[1], [0], [0], [1], [0, 0, 1, 1], [], []>} : vector<4x162xf32>, vector<162x128xf32>, vector<4x128xf32> -> vector<4x128xf32>
    %128 = arith.negf %127 : vector<4x128xf32>
    %129 = math.exp %128 : vector<4x128xf32>
    %cst_53 = arith.constant 1.000000e+00 : f32
    %130 = vector.broadcast %cst_53 : f32 to vector<4x128xf32>
    %131 = arith.addf %130, %129 : vector<4x128xf32>
    %132 = arith.divf %130, %131 : vector<4x128xf32>
    %133 = math.tanh %127 : vector<4x128xf32>
    %134 = vector.extract_strided_slice %132 {offsets = [0, 0], sizes = [4, 32], strides = [1, 1]} : vector<4x128xf32> to vector<4x32xf32>
    %135 = vector.extract_strided_slice %132 {offsets = [0, 32], sizes = [4, 32], strides = [1, 1]} : vector<4x128xf32> to vector<4x32xf32>
    %136 = vector.extract_strided_slice %133 {offsets = [0, 64], sizes = [4, 32], strides = [1, 1]} : vector<4x128xf32> to vector<4x32xf32>
    %137 = vector.extract_strided_slice %132 {offsets = [0, 96], sizes = [4, 32], strides = [1, 1]} : vector<4x128xf32> to vector<4x32xf32>
    %138 = arith.mulf %135, %96 : vector<4x32xf32>
    %139 = arith.mulf %134, %136 : vector<4x32xf32>
    %140 = arith.addf %138, %139 : vector<4x32xf32>
    %141 = math.tanh %140 : vector<4x32xf32>
    %142 = arith.mulf %137, %141 : vector<4x32xf32>
    %c3_i32 = arith.constant 3 : i32
    %143 = tpu.concatenate %142, %140 in 1 : vector<4x32xf32>, vector<4x32xf32> -> vector<4x64xf32>
    %c136_54 = arith.constant 136 : index
    %c0_55 = arith.constant 0 : index
    %144 = vector.load %arg2[%c136_54, %c0_55] : memref<528x128xf32, #tpu.memory_space<vmem>>, vector<64x128xf32>
    %cst_56 = arith.constant dense<0.000000e+00> : vector<4x128xf32>
    %145 = tpu.matmul %143, %144, %cst_56 {dimension_numbers = #tpu.dot_dimension_numbers<[1], [0], [0], [1], [0, 0, 1, 1], [], []>} : vector<4x64xf32>, vector<64x128xf32>, vector<4x128xf32> -> vector<4x128xf32>
    %146 = arith.mulf %145, %1 : vector<4x128xf32>
    %cst_57 = arith.constant dense<0.000000e+00> : vector<128xf32>
    %147 = vector.multi_reduction <add>, %146, %cst_57 [0] : vector<4x128xf32> to vector<128xf32>
    %148 = vector.shape_cast %147 : vector<128xf32> to vector<1x128xf32>
    %149 = vector.broadcast %148 : vector<1x128xf32> to vector<8x128xf32>
    %150 = arith.addf %6, %149 : vector<8x128xf32>
    %151 = math.tanh %150 : vector<8x128xf32>
    %c208_58 = arith.constant 208 : index
    %c0_59 = arith.constant 0 : index
    %152 = vector.load %arg2[%c208_58, %c0_59] : memref<528x128xf32, #tpu.memory_space<vmem>>, vector<128x4xf32>
    %cst_60 = arith.constant dense<0.000000e+00> : vector<8x4xf32>
    %153 = tpu.matmul %151, %152, %cst_60 {dimension_numbers = #tpu.dot_dimension_numbers<[1], [0], [0], [1], [0, 0, 1, 1], [], []>} : vector<8x128xf32>, vector<128x4xf32>, vector<8x4xf32> -> vector<8x4xf32>
    %154 = math.exp %153 : vector<8x4xf32>
    %cst_61 = arith.constant dense<0.000000e+00> : vector<4xf32>
    %155 = vector.multi_reduction <add>, %154, %cst_61 [0] : vector<8x4xf32> to vector<4xf32>
    %156 = vector.shape_cast %155 : vector<4xf32> to vector<1x4xf32>
    %157 = tpu.reciprocal %156 : vector<1x4xf32> -> vector<1x4xf32>
    %158 = vector.broadcast %157 : vector<1x4xf32> to vector<8x4xf32>
    %159 = arith.mulf %154, %158 : vector<8x4xf32>
    %cst_62 = arith.constant dense<0.000000e+00> : vector<8x128xf32>
    %160 = tpu.matmul %159, %1, %cst_62 {dimension_numbers = #tpu.dot_dimension_numbers<[1], [0], [0], [1], [0, 0, 1, 1], [], []>} : vector<8x4xf32>, vector<4x128xf32>, vector<8x128xf32> -> vector<8x128xf32>
    %161 = arith.mulf %160, %0 : vector<8x128xf32>
    %cst_63 = arith.constant dense<0.000000e+00> : vector<128xf32>
    %162 = vector.multi_reduction <add>, %161, %cst_63 [0] : vector<8x128xf32> to vector<128xf32>
    %163 = vector.shape_cast %162 : vector<128xf32> to vector<1x128xf32>
    %164 = vector.broadcast %163 : vector<1x128xf32> to vector<4x128xf32>
    %165 = arith.mulf %164, %1 : vector<4x128xf32>
    %166 = arith.index_cast %c3_i32 : i32 to index
    %c0_64 = arith.constant 0 : index
    %c0_65 = arith.constant 0 : index
    %167 = vector.load %arg1[%166, %c0_64, %c0_65] : memref<8x4x1xf32, #tpu.memory_space<vmem>>, vector<1x4x1xf32>
    %168 = vector.shape_cast %167 : vector<1x4x1xf32> to vector<4x1xf32>
    %169 = tpu.concatenate %165, %168, %7, %142 in 1 : vector<4x128xf32>, vector<4x1xf32>, vector<4x1xf32>, vector<4x32xf32> -> vector<4x162xf32>
    %c336_66 = arith.constant 336 : index
    %c0_67 = arith.constant 0 : index
    %170 = vector.load %arg2[%c336_66, %c0_67] : memref<528x128xf32, #tpu.memory_space<vmem>>, vector<162x128xf32>
    %cst_68 = arith.constant dense<0.000000e+00> : vector<4x128xf32>
    %171 = tpu.matmul %169, %170, %cst_68 {dimension_numbers = #tpu.dot_dimension_numbers<[1], [0], [0], [1], [0, 0, 1, 1], [], []>} : vector<4x162xf32>, vector<162x128xf32>, vector<4x128xf32> -> vector<4x128xf32>
    %172 = arith.negf %171 : vector<4x128xf32>
    %173 = math.exp %172 : vector<4x128xf32>
    %cst_69 = arith.constant 1.000000e+00 : f32
    %174 = vector.broadcast %cst_69 : f32 to vector<4x128xf32>
    %175 = arith.addf %174, %173 : vector<4x128xf32>
    %176 = arith.divf %174, %175 : vector<4x128xf32>
    %177 = math.tanh %171 : vector<4x128xf32>
    %178 = vector.extract_strided_slice %176 {offsets = [0, 0], sizes = [4, 32], strides = [1, 1]} : vector<4x128xf32> to vector<4x32xf32>
    %179 = vector.extract_strided_slice %176 {offsets = [0, 32], sizes = [4, 32], strides = [1, 1]} : vector<4x128xf32> to vector<4x32xf32>
    %180 = vector.extract_strided_slice %177 {offsets = [0, 64], sizes = [4, 32], strides = [1, 1]} : vector<4x128xf32> to vector<4x32xf32>
    %181 = vector.extract_strided_slice %176 {offsets = [0, 96], sizes = [4, 32], strides = [1, 1]} : vector<4x128xf32> to vector<4x32xf32>
    %182 = arith.mulf %179, %140 : vector<4x32xf32>
    %183 = arith.mulf %178, %180 : vector<4x32xf32>
    %184 = arith.addf %182, %183 : vector<4x32xf32>
    %185 = math.tanh %184 : vector<4x32xf32>
    %186 = arith.mulf %181, %185 : vector<4x32xf32>
    %c4_i32 = arith.constant 4 : i32
    %187 = tpu.concatenate %186, %184 in 1 : vector<4x32xf32>, vector<4x32xf32> -> vector<4x64xf32>
    %c136_70 = arith.constant 136 : index
    %c0_71 = arith.constant 0 : index
    %188 = vector.load %arg2[%c136_70, %c0_71] : memref<528x128xf32, #tpu.memory_space<vmem>>, vector<64x128xf32>
    %cst_72 = arith.constant dense<0.000000e+00> : vector<4x128xf32>
    %189 = tpu.matmul %187, %188, %cst_72 {dimension_numbers = #tpu.dot_dimension_numbers<[1], [0], [0], [1], [0, 0, 1, 1], [], []>} : vector<4x64xf32>, vector<64x128xf32>, vector<4x128xf32> -> vector<4x128xf32>
    %190 = arith.mulf %189, %1 : vector<4x128xf32>
    %cst_73 = arith.constant dense<0.000000e+00> : vector<128xf32>
    %191 = vector.multi_reduction <add>, %190, %cst_73 [0] : vector<4x128xf32> to vector<128xf32>
    %192 = vector.shape_cast %191 : vector<128xf32> to vector<1x128xf32>
    %193 = vector.broadcast %192 : vector<1x128xf32> to vector<8x128xf32>
    %194 = arith.addf %6, %193 : vector<8x128xf32>
    %195 = math.tanh %194 : vector<8x128xf32>
    %c208_74 = arith.constant 208 : index
    %c0_75 = arith.constant 0 : index
    %196 = vector.load %arg2[%c208_74, %c0_75] : memref<528x128xf32, #tpu.memory_space<vmem>>, vector<128x4xf32>
    %cst_76 = arith.constant dense<0.000000e+00> : vector<8x4xf32>
    %197 = tpu.matmul %195, %196, %cst_76 {dimension_numbers = #tpu.dot_dimension_numbers<[1], [0], [0], [1], [0, 0, 1, 1], [], []>} : vector<8x128xf32>, vector<128x4xf32>, vector<8x4xf32> -> vector<8x4xf32>
    %198 = math.exp %197 : vector<8x4xf32>
    %cst_77 = arith.constant dense<0.000000e+00> : vector<4xf32>
    %199 = vector.multi_reduction <add>, %198, %cst_77 [0] : vector<8x4xf32> to vector<4xf32>
    %200 = vector.shape_cast %199 : vector<4xf32> to vector<1x4xf32>
    %201 = tpu.reciprocal %200 : vector<1x4xf32> -> vector<1x4xf32>
    %202 = vector.broadcast %201 : vector<1x4xf32> to vector<8x4xf32>
    %203 = arith.mulf %198, %202 : vector<8x4xf32>
    %cst_78 = arith.constant dense<0.000000e+00> : vector<8x128xf32>
    %204 = tpu.matmul %203, %1, %cst_78 {dimension_numbers = #tpu.dot_dimension_numbers<[1], [0], [0], [1], [0, 0, 1, 1], [], []>} : vector<8x4xf32>, vector<4x128xf32>, vector<8x128xf32> -> vector<8x128xf32>
    %205 = arith.mulf %204, %0 : vector<8x128xf32>
    %cst_79 = arith.constant dense<0.000000e+00> : vector<128xf32>
    %206 = vector.multi_reduction <add>, %205, %cst_79 [0] : vector<8x128xf32> to vector<128xf32>
    %207 = vector.shape_cast %206 : vector<128xf32> to vector<1x128xf32>
    %208 = vector.broadcast %207 : vector<1x128xf32> to vector<4x128xf32>
    %209 = arith.mulf %208, %1 : vector<4x128xf32>
    %210 = arith.index_cast %c4_i32 : i32 to index
    %c0_80 = arith.constant 0 : index
    %c0_81 = arith.constant 0 : index
    %211 = vector.load %arg1[%210, %c0_80, %c0_81] : memref<8x4x1xf32, #tpu.memory_space<vmem>>, vector<1x4x1xf32>
    %212 = vector.shape_cast %211 : vector<1x4x1xf32> to vector<4x1xf32>
    %213 = tpu.concatenate %209, %212, %7, %186 in 1 : vector<4x128xf32>, vector<4x1xf32>, vector<4x1xf32>, vector<4x32xf32> -> vector<4x162xf32>
    %c336_82 = arith.constant 336 : index
    %c0_83 = arith.constant 0 : index
    %214 = vector.load %arg2[%c336_82, %c0_83] : memref<528x128xf32, #tpu.memory_space<vmem>>, vector<162x128xf32>
    %cst_84 = arith.constant dense<0.000000e+00> : vector<4x128xf32>
    %215 = tpu.matmul %213, %214, %cst_84 {dimension_numbers = #tpu.dot_dimension_numbers<[1], [0], [0], [1], [0, 0, 1, 1], [], []>} : vector<4x162xf32>, vector<162x128xf32>, vector<4x128xf32> -> vector<4x128xf32>
    %216 = arith.negf %215 : vector<4x128xf32>
    %217 = math.exp %216 : vector<4x128xf32>
    %cst_85 = arith.constant 1.000000e+00 : f32
    %218 = vector.broadcast %cst_85 : f32 to vector<4x128xf32>
    %219 = arith.addf %218, %217 : vector<4x128xf32>
    %220 = arith.divf %218, %219 : vector<4x128xf32>
    %221 = math.tanh %215 : vector<4x128xf32>
    %222 = vector.extract_strided_slice %220 {offsets = [0, 0], sizes = [4, 32], strides = [1, 1]} : vector<4x128xf32> to vector<4x32xf32>
    %223 = vector.extract_strided_slice %220 {offsets = [0, 32], sizes = [4, 32], strides = [1, 1]} : vector<4x128xf32> to vector<4x32xf32>
    %224 = vector.extract_strided_slice %221 {offsets = [0, 64], sizes = [4, 32], strides = [1, 1]} : vector<4x128xf32> to vector<4x32xf32>
    %225 = vector.extract_strided_slice %220 {offsets = [0, 96], sizes = [4, 32], strides = [1, 1]} : vector<4x128xf32> to vector<4x32xf32>
    %226 = arith.mulf %223, %184 : vector<4x32xf32>
    %227 = arith.mulf %222, %224 : vector<4x32xf32>
    %228 = arith.addf %226, %227 : vector<4x32xf32>
    %229 = math.tanh %228 : vector<4x32xf32>
    %230 = arith.mulf %225, %229 : vector<4x32xf32>
    %c5_i32 = arith.constant 5 : i32
    %231 = tpu.concatenate %230, %228 in 1 : vector<4x32xf32>, vector<4x32xf32> -> vector<4x64xf32>
    %c136_86 = arith.constant 136 : index
    %c0_87 = arith.constant 0 : index
    %232 = vector.load %arg2[%c136_86, %c0_87] : memref<528x128xf32, #tpu.memory_space<vmem>>, vector<64x128xf32>
    %cst_88 = arith.constant dense<0.000000e+00> : vector<4x128xf32>
    %233 = tpu.matmul %231, %232, %cst_88 {dimension_numbers = #tpu.dot_dimension_numbers<[1], [0], [0], [1], [0, 0, 1, 1], [], []>} : vector<4x64xf32>, vector<64x128xf32>, vector<4x128xf32> -> vector<4x128xf32>
    %234 = arith.mulf %233, %1 : vector<4x128xf32>
    %cst_89 = arith.constant dense<0.000000e+00> : vector<128xf32>
    %235 = vector.multi_reduction <add>, %234, %cst_89 [0] : vector<4x128xf32> to vector<128xf32>
    %236 = vector.shape_cast %235 : vector<128xf32> to vector<1x128xf32>
    %237 = vector.broadcast %236 : vector<1x128xf32> to vector<8x128xf32>
    %238 = arith.addf %6, %237 : vector<8x128xf32>
    %239 = math.tanh %238 : vector<8x128xf32>
    %c208_90 = arith.constant 208 : index
    %c0_91 = arith.constant 0 : index
    %240 = vector.load %arg2[%c208_90, %c0_91] : memref<528x128xf32, #tpu.memory_space<vmem>>, vector<128x4xf32>
    %cst_92 = arith.constant dense<0.000000e+00> : vector<8x4xf32>
    %241 = tpu.matmul %239, %240, %cst_92 {dimension_numbers = #tpu.dot_dimension_numbers<[1], [0], [0], [1], [0, 0, 1, 1], [], []>} : vector<8x128xf32>, vector<128x4xf32>, vector<8x4xf32> -> vector<8x4xf32>
    %242 = math.exp %241 : vector<8x4xf32>
    %cst_93 = arith.constant dense<0.000000e+00> : vector<4xf32>
    %243 = vector.multi_reduction <add>, %242, %cst_93 [0] : vector<8x4xf32> to vector<4xf32>
    %244 = vector.shape_cast %243 : vector<4xf32> to vector<1x4xf32>
    %245 = tpu.reciprocal %244 : vector<1x4xf32> -> vector<1x4xf32>
    %246 = vector.broadcast %245 : vector<1x4xf32> to vector<8x4xf32>
    %247 = arith.mulf %242, %246 : vector<8x4xf32>
    %cst_94 = arith.constant dense<0.000000e+00> : vector<8x128xf32>
    %248 = tpu.matmul %247, %1, %cst_94 {dimension_numbers = #tpu.dot_dimension_numbers<[1], [0], [0], [1], [0, 0, 1, 1], [], []>} : vector<8x4xf32>, vector<4x128xf32>, vector<8x128xf32> -> vector<8x128xf32>
    %249 = arith.mulf %248, %0 : vector<8x128xf32>
    %cst_95 = arith.constant dense<0.000000e+00> : vector<128xf32>
    %250 = vector.multi_reduction <add>, %249, %cst_95 [0] : vector<8x128xf32> to vector<128xf32>
    %251 = vector.shape_cast %250 : vector<128xf32> to vector<1x128xf32>
    %252 = vector.broadcast %251 : vector<1x128xf32> to vector<4x128xf32>
    %253 = arith.mulf %252, %1 : vector<4x128xf32>
    %254 = arith.index_cast %c5_i32 : i32 to index
    %c0_96 = arith.constant 0 : index
    %c0_97 = arith.constant 0 : index
    %255 = vector.load %arg1[%254, %c0_96, %c0_97] : memref<8x4x1xf32, #tpu.memory_space<vmem>>, vector<1x4x1xf32>
    %256 = vector.shape_cast %255 : vector<1x4x1xf32> to vector<4x1xf32>
    %257 = tpu.concatenate %253, %256, %7, %230 in 1 : vector<4x128xf32>, vector<4x1xf32>, vector<4x1xf32>, vector<4x32xf32> -> vector<4x162xf32>
    %c336_98 = arith.constant 336 : index
    %c0_99 = arith.constant 0 : index
    %258 = vector.load %arg2[%c336_98, %c0_99] : memref<528x128xf32, #tpu.memory_space<vmem>>, vector<162x128xf32>
    %cst_100 = arith.constant dense<0.000000e+00> : vector<4x128xf32>
    %259 = tpu.matmul %257, %258, %cst_100 {dimension_numbers = #tpu.dot_dimension_numbers<[1], [0], [0], [1], [0, 0, 1, 1], [], []>} : vector<4x162xf32>, vector<162x128xf32>, vector<4x128xf32> -> vector<4x128xf32>
    %260 = arith.negf %259 : vector<4x128xf32>
    %261 = math.exp %260 : vector<4x128xf32>
    %cst_101 = arith.constant 1.000000e+00 : f32
    %262 = vector.broadcast %cst_101 : f32 to vector<4x128xf32>
    %263 = arith.addf %262, %261 : vector<4x128xf32>
    %264 = arith.divf %262, %263 : vector<4x128xf32>
    %265 = math.tanh %259 : vector<4x128xf32>
    %266 = vector.extract_strided_slice %264 {offsets = [0, 0], sizes = [4, 32], strides = [1, 1]} : vector<4x128xf32> to vector<4x32xf32>
    %267 = vector.extract_strided_slice %264 {offsets = [0, 32], sizes = [4, 32], strides = [1, 1]} : vector<4x128xf32> to vector<4x32xf32>
    %268 = vector.extract_strided_slice %265 {offsets = [0, 64], sizes = [4, 32], strides = [1, 1]} : vector<4x128xf32> to vector<4x32xf32>
    %269 = vector.extract_strided_slice %264 {offsets = [0, 96], sizes = [4, 32], strides = [1, 1]} : vector<4x128xf32> to vector<4x32xf32>
    %270 = arith.mulf %267, %228 : vector<4x32xf32>
    %271 = arith.mulf %266, %268 : vector<4x32xf32>
    %272 = arith.addf %270, %271 : vector<4x32xf32>
    %273 = math.tanh %272 : vector<4x32xf32>
    %274 = arith.mulf %269, %273 : vector<4x32xf32>
    %c6_i32 = arith.constant 6 : i32
    %275 = tpu.concatenate %274, %272 in 1 : vector<4x32xf32>, vector<4x32xf32> -> vector<4x64xf32>
    %c136_102 = arith.constant 136 : index
    %c0_103 = arith.constant 0 : index
    %276 = vector.load %arg2[%c136_102, %c0_103] : memref<528x128xf32, #tpu.memory_space<vmem>>, vector<64x128xf32>
    %cst_104 = arith.constant dense<0.000000e+00> : vector<4x128xf32>
    %277 = tpu.matmul %275, %276, %cst_104 {dimension_numbers = #tpu.dot_dimension_numbers<[1], [0], [0], [1], [0, 0, 1, 1], [], []>} : vector<4x64xf32>, vector<64x128xf32>, vector<4x128xf32> -> vector<4x128xf32>
    %278 = arith.mulf %277, %1 : vector<4x128xf32>
    %cst_105 = arith.constant dense<0.000000e+00> : vector<128xf32>
    %279 = vector.multi_reduction <add>, %278, %cst_105 [0] : vector<4x128xf32> to vector<128xf32>
    %280 = vector.shape_cast %279 : vector<128xf32> to vector<1x128xf32>
    %281 = vector.broadcast %280 : vector<1x128xf32> to vector<8x128xf32>
    %282 = arith.addf %6, %281 : vector<8x128xf32>
    %283 = math.tanh %282 : vector<8x128xf32>
    %c208_106 = arith.constant 208 : index
    %c0_107 = arith.constant 0 : index
    %284 = vector.load %arg2[%c208_106, %c0_107] : memref<528x128xf32, #tpu.memory_space<vmem>>, vector<128x4xf32>
    %cst_108 = arith.constant dense<0.000000e+00> : vector<8x4xf32>
    %285 = tpu.matmul %283, %284, %cst_108 {dimension_numbers = #tpu.dot_dimension_numbers<[1], [0], [0], [1], [0, 0, 1, 1], [], []>} : vector<8x128xf32>, vector<128x4xf32>, vector<8x4xf32> -> vector<8x4xf32>
    %286 = math.exp %285 : vector<8x4xf32>
    %cst_109 = arith.constant dense<0.000000e+00> : vector<4xf32>
    %287 = vector.multi_reduction <add>, %286, %cst_109 [0] : vector<8x4xf32> to vector<4xf32>
    %288 = vector.shape_cast %287 : vector<4xf32> to vector<1x4xf32>
    %289 = tpu.reciprocal %288 : vector<1x4xf32> -> vector<1x4xf32>
    %290 = vector.broadcast %289 : vector<1x4xf32> to vector<8x4xf32>
    %291 = arith.mulf %286, %290 : vector<8x4xf32>
    %cst_110 = arith.constant dense<0.000000e+00> : vector<8x128xf32>
    %292 = tpu.matmul %291, %1, %cst_110 {dimension_numbers = #tpu.dot_dimension_numbers<[1], [0], [0], [1], [0, 0, 1, 1], [], []>} : vector<8x4xf32>, vector<4x128xf32>, vector<8x128xf32> -> vector<8x128xf32>
    %293 = arith.mulf %292, %0 : vector<8x128xf32>
    %cst_111 = arith.constant dense<0.000000e+00> : vector<128xf32>
    %294 = vector.multi_reduction <add>, %293, %cst_111 [0] : vector<8x128xf32> to vector<128xf32>
    %295 = vector.shape_cast %294 : vector<128xf32> to vector<1x128xf32>
    %296 = vector.broadcast %295 : vector<1x128xf32> to vector<4x128xf32>
    %297 = arith.mulf %296, %1 : vector<4x128xf32>
    %298 = arith.index_cast %c6_i32 : i32 to index
    %c0_112 = arith.constant 0 : index
    %c0_113 = arith.constant 0 : index
    %299 = vector.load %arg1[%298, %c0_112, %c0_113] : memref<8x4x1xf32, #tpu.memory_space<vmem>>, vector<1x4x1xf32>
    %300 = vector.shape_cast %299 : vector<1x4x1xf32> to vector<4x1xf32>
    %301 = tpu.concatenate %297, %300, %7, %274 in 1 : vector<4x128xf32>, vector<4x1xf32>, vector<4x1xf32>, vector<4x32xf32> -> vector<4x162xf32>
    %c336_114 = arith.constant 336 : index
    %c0_115 = arith.constant 0 : index
    %302 = vector.load %arg2[%c336_114, %c0_115] : memref<528x128xf32, #tpu.memory_space<vmem>>, vector<162x128xf32>
    %cst_116 = arith.constant dense<0.000000e+00> : vector<4x128xf32>
    %303 = tpu.matmul %301, %302, %cst_116 {dimension_numbers = #tpu.dot_dimension_numbers<[1], [0], [0], [1], [0, 0, 1, 1], [], []>} : vector<4x162xf32>, vector<162x128xf32>, vector<4x128xf32> -> vector<4x128xf32>
    %304 = arith.negf %303 : vector<4x128xf32>
    %305 = math.exp %304 : vector<4x128xf32>
    %cst_117 = arith.constant 1.000000e+00 : f32
    %306 = vector.broadcast %cst_117 : f32 to vector<4x128xf32>
    %307 = arith.addf %306, %305 : vector<4x128xf32>
    %308 = arith.divf %306, %307 : vector<4x128xf32>
    %309 = math.tanh %303 : vector<4x128xf32>
    %310 = vector.extract_strided_slice %308 {offsets = [0, 0], sizes = [4, 32], strides = [1, 1]} : vector<4x128xf32> to vector<4x32xf32>
    %311 = vector.extract_strided_slice %308 {offsets = [0, 32], sizes = [4, 32], strides = [1, 1]} : vector<4x128xf32> to vector<4x32xf32>
    %312 = vector.extract_strided_slice %309 {offsets = [0, 64], sizes = [4, 32], strides = [1, 1]} : vector<4x128xf32> to vector<4x32xf32>
    %313 = vector.extract_strided_slice %308 {offsets = [0, 96], sizes = [4, 32], strides = [1, 1]} : vector<4x128xf32> to vector<4x32xf32>
    %314 = arith.mulf %311, %272 : vector<4x32xf32>
    %315 = arith.mulf %310, %312 : vector<4x32xf32>
    %316 = arith.addf %314, %315 : vector<4x32xf32>
    %317 = math.tanh %316 : vector<4x32xf32>
    %318 = arith.mulf %313, %317 : vector<4x32xf32>
    %c7_i32 = arith.constant 7 : i32
    %319 = tpu.concatenate %318, %316 in 1 : vector<4x32xf32>, vector<4x32xf32> -> vector<4x64xf32>
    %c136_118 = arith.constant 136 : index
    %c0_119 = arith.constant 0 : index
    %320 = vector.load %arg2[%c136_118, %c0_119] : memref<528x128xf32, #tpu.memory_space<vmem>>, vector<64x128xf32>
    %cst_120 = arith.constant dense<0.000000e+00> : vector<4x128xf32>
    %321 = tpu.matmul %319, %320, %cst_120 {dimension_numbers = #tpu.dot_dimension_numbers<[1], [0], [0], [1], [0, 0, 1, 1], [], []>} : vector<4x64xf32>, vector<64x128xf32>, vector<4x128xf32> -> vector<4x128xf32>
    %322 = arith.mulf %321, %1 : vector<4x128xf32>
    %cst_121 = arith.constant dense<0.000000e+00> : vector<128xf32>
    %323 = vector.multi_reduction <add>, %322, %cst_121 [0] : vector<4x128xf32> to vector<128xf32>
    %324 = vector.shape_cast %323 : vector<128xf32> to vector<1x128xf32>
    %325 = vector.broadcast %324 : vector<1x128xf32> to vector<8x128xf32>
    %326 = arith.addf %6, %325 : vector<8x128xf32>
    %327 = math.tanh %326 : vector<8x128xf32>
    %c208_122 = arith.constant 208 : index
    %c0_123 = arith.constant 0 : index
    %328 = vector.load %arg2[%c208_122, %c0_123] : memref<528x128xf32, #tpu.memory_space<vmem>>, vector<128x4xf32>
    %cst_124 = arith.constant dense<0.000000e+00> : vector<8x4xf32>
    %329 = tpu.matmul %327, %328, %cst_124 {dimension_numbers = #tpu.dot_dimension_numbers<[1], [0], [0], [1], [0, 0, 1, 1], [], []>} : vector<8x128xf32>, vector<128x4xf32>, vector<8x4xf32> -> vector<8x4xf32>
    %330 = math.exp %329 : vector<8x4xf32>
    %cst_125 = arith.constant dense<0.000000e+00> : vector<4xf32>
    %331 = vector.multi_reduction <add>, %330, %cst_125 [0] : vector<8x4xf32> to vector<4xf32>
    %332 = vector.shape_cast %331 : vector<4xf32> to vector<1x4xf32>
    %333 = tpu.reciprocal %332 : vector<1x4xf32> -> vector<1x4xf32>
    %334 = vector.broadcast %333 : vector<1x4xf32> to vector<8x4xf32>
    %335 = arith.mulf %330, %334 : vector<8x4xf32>
    %cst_126 = arith.constant dense<0.000000e+00> : vector<8x128xf32>
    %336 = tpu.matmul %335, %1, %cst_126 {dimension_numbers = #tpu.dot_dimension_numbers<[1], [0], [0], [1], [0, 0, 1, 1], [], []>} : vector<8x4xf32>, vector<4x128xf32>, vector<8x128xf32> -> vector<8x128xf32>
    %337 = arith.mulf %336, %0 : vector<8x128xf32>
    %cst_127 = arith.constant dense<0.000000e+00> : vector<128xf32>
    %338 = vector.multi_reduction <add>, %337, %cst_127 [0] : vector<8x128xf32> to vector<128xf32>
    %339 = vector.shape_cast %338 : vector<128xf32> to vector<1x128xf32>
    %340 = vector.broadcast %339 : vector<1x128xf32> to vector<4x128xf32>
    %341 = arith.mulf %340, %1 : vector<4x128xf32>
    %342 = arith.index_cast %c7_i32 : i32 to index
    %c0_128 = arith.constant 0 : index
    %c0_129 = arith.constant 0 : index
    %343 = vector.load %arg1[%342, %c0_128, %c0_129] : memref<8x4x1xf32, #tpu.memory_space<vmem>>, vector<1x4x1xf32>
    %344 = vector.shape_cast %343 : vector<1x4x1xf32> to vector<4x1xf32>
    %345 = tpu.concatenate %341, %344, %7, %318 in 1 : vector<4x128xf32>, vector<4x1xf32>, vector<4x1xf32>, vector<4x32xf32> -> vector<4x162xf32>
    %c336_130 = arith.constant 336 : index
    %c0_131 = arith.constant 0 : index
    %346 = vector.load %arg2[%c336_130, %c0_131] : memref<528x128xf32, #tpu.memory_space<vmem>>, vector<162x128xf32>
    %cst_132 = arith.constant dense<0.000000e+00> : vector<4x128xf32>
    %347 = tpu.matmul %345, %346, %cst_132 {dimension_numbers = #tpu.dot_dimension_numbers<[1], [0], [0], [1], [0, 0, 1, 1], [], []>} : vector<4x162xf32>, vector<162x128xf32>, vector<4x128xf32> -> vector<4x128xf32>
    %348 = arith.negf %347 : vector<4x128xf32>
    %349 = math.exp %348 : vector<4x128xf32>
    %cst_133 = arith.constant 1.000000e+00 : f32
    %350 = vector.broadcast %cst_133 : f32 to vector<4x128xf32>
    %351 = arith.addf %350, %349 : vector<4x128xf32>
    %352 = arith.divf %350, %351 : vector<4x128xf32>
    %353 = math.tanh %347 : vector<4x128xf32>
    %354 = vector.extract_strided_slice %352 {offsets = [0, 0], sizes = [4, 32], strides = [1, 1]} : vector<4x128xf32> to vector<4x32xf32>
    %355 = vector.extract_strided_slice %352 {offsets = [0, 32], sizes = [4, 32], strides = [1, 1]} : vector<4x128xf32> to vector<4x32xf32>
    %356 = vector.extract_strided_slice %353 {offsets = [0, 64], sizes = [4, 32], strides = [1, 1]} : vector<4x128xf32> to vector<4x32xf32>
    %357 = vector.extract_strided_slice %352 {offsets = [0, 96], sizes = [4, 32], strides = [1, 1]} : vector<4x128xf32> to vector<4x32xf32>
    %358 = arith.mulf %355, %316 : vector<4x32xf32>
    %359 = arith.mulf %354, %356 : vector<4x32xf32>
    %360 = arith.addf %358, %359 : vector<4x32xf32>
    %361 = math.tanh %360 : vector<4x32xf32>
    %362 = arith.mulf %357, %361 : vector<4x32xf32>
    %c8_i32 = arith.constant 8 : i32
    %c504 = arith.constant 504 : index
    %c0_134 = arith.constant 0 : index
    %363 = vector.load %arg2[%c504, %c0_134] : memref<528x128xf32, #tpu.memory_space<vmem>>, vector<1x32xf32>
    %c512 = arith.constant 512 : index
    %c0_135 = arith.constant 0 : index
    %364 = vector.load %arg2[%c512, %c0_135] : memref<528x128xf32, #tpu.memory_space<vmem>>, vector<1x128xf32>
    %c520 = arith.constant 520 : index
    %c0_136 = arith.constant 0 : index
    %365 = vector.load %arg2[%c520, %c0_136] : memref<528x128xf32, #tpu.memory_space<vmem>>, vector<1x1xf32>
    %366 = vector.broadcast %363 : vector<1x32xf32> to vector<4x32xf32>
    %367 = arith.mulf %362, %366 : vector<4x32xf32>
    %cst_137 = arith.constant dense<0.000000e+00> : vector<4xf32>
    %368 = vector.multi_reduction <add>, %367, %cst_137 [1] : vector<4x32xf32> to vector<4xf32>
    %369 = vector.shape_cast %368 : vector<4xf32> to vector<4x1xf32>
    %370 = vector.broadcast %364 : vector<1x128xf32> to vector<4x128xf32>
    %371 = arith.mulf %341, %370 : vector<4x128xf32>
    %cst_138 = arith.constant dense<0.000000e+00> : vector<4xf32>
    %372 = vector.multi_reduction <add>, %371, %cst_138 [1] : vector<4x128xf32> to vector<4xf32>
    %373 = vector.shape_cast %372 : vector<4xf32> to vector<4x1xf32>
    %374 = arith.addf %369, %373 : vector<4x1xf32>
    %375 = vector.broadcast %365 : vector<1x1xf32> to vector<4x1xf32>
    %376 = arith.addf %374, %375 : vector<4x1xf32>
    %c0_139 = arith.constant 0 : index
    %c0_140 = arith.constant 0 : index
    %377 = vector.load %arg3[%c0_139, %c0_140] : memref<4x1xf32, #tpu.memory_space<vmem>>, vector<4x1xf32>
    tpu.vector_store %arg3[%c0_139, %c0_140], %376 {strides = array<i32>} : memref<4x1xf32, #tpu.memory_space<vmem>>, vector<4x1xf32>,
    return
  }
}

</mosaic_0001>

<bundles_post_ra>
// kernel: tpu_custom_call.1
= control target key start
LH: loop header
LB: loop body
LE: loop exit
PB: predicated region body
PF: predicated region fallthrough
CT: control target
= control target key end

     0   :  { %8 = vsyncpa [#allocation3], 0  ;;  %s4551_s12 = smov [#allocation2]   ;;  %s5313_s0 = inlined_call_operand.vmem [shape: f32[8,128], index: 0, kind: input, shape index: {}]   ;;  %s5314_s1 = inlined_call_operand.vmem [shape: f32[8,4,1], index: 1, kind: input, shape index: {}]   ;;  %s5315_s2 = inlined_call_operand.hbm [shape: f32[528,128], index: 2, kind: input, shape index: {}]   ;;  %s5316_s3 = inlined_call_operand.vmem [shape: f32[4,1], index: 3, kind: output, shape index: {}]  }
   0x1   :  { %s18_s13 = sshll.u32 %s4551_s12, 4  ;;  %s4527_s16 = scalar_lea.hbm %s5315_s2, 8448  ;;  %s19_s13 = int_to_ptr.vmem [resolvable:$true] %s18_s13 }
   0x2   :  { %p4528_p0 = scmp.ne.s32.totalorder %s5315_s2, %s4527_s16  ;;  %p4531_p1 = scmp.lt.u32.totalorder %s4527_s16, %s5315_s2 }
   0x4   :  { %p4533_p2 = pnand %p4531_p1, %p4528_p0 }
   0x6   :  { %4536 = shalt.err (!%p4533_p2)
}
   0x7   :  { %s4537_s21 = scalar_lea.vmem %s19_s13, 8448  ;;  %p4542_p4 = scmp.lt.s32.totalorder %s19_s13, %s19_s13 }
   0x8   :  { %p4538_p3 = scmp.ne.s32.totalorder %s19_s13, %s4537_s21  ;;  %p4543_p5 = scmp.lt.s32.totalorder %s4537_s21, %s4537_s21 }
   0xa   :  { %p4544_p6 = por %p4543_p5, %p4542_p4 }
   0xc   :  { %p4545_p7 = pnand %p4544_p6, %p4538_p3 }
   0xe   :  { %4548 = shalt.err (!%p4545_p7)
}
   0xf   :  { %s4552_s22 = smov 128   ;;  %s4553_s23 = smov 8  }
  0x10   :  { %24 = dma.hbm_to_vmem [thread:$0]  %s5315_s2, 8448, %s19_s13, [#allocation3], %s4552_s22, %s4552_s22, %s4553_s23  }
  0x11   :  { %4549 = dma.done.wait [#allocation3], 8448  }
  0x12   :  { %4550 = vsyncadd [#allocation3], 4294958848  ;;  %v4554_v0 = vmov 0.0|0.0   ;;  %vm4555_vm0 = vmmov 0   ;;  %v4556_v1 = vmov 0.0   ;;  %v30_v2 = vld [vmem:[#allocation2] sm:$0xff] }
  0x13   :  { %3850 = vmatprep.subr.bf16.mxu0 %v4554_v0  ;;  %3874 = vmatprep.subr.bf16.mxu1 %v4554_v0  ;;  %v31_v3 = vld [vmem:[#allocation2 + $0x8] sm:$0xff]  ;;  %v122_v6 = vld [vmem:[#allocation2 + $0x90] sm:$0xff]  ;;  %v33_v8 = vld [vmem:[#allocation2 + $0x18] sm:$0xff]  ;;  %vm204_vm1 = vcmask 1043456   ;;  %vm302_vm2 = vcmask 31744   ;;  %vm397_vm3 = vcmask 7168  }
  0x14   :  { %3394 = vmatprep.mubr.msk.f32.mxu1 %vm4555_vm0, %v4556_v1  ;;  %3375 = vmatprep.mubr.msk.f32.mxu0 %vm4555_vm0, %v4556_v1  ;;  %v121_v4 = vld [vmem:[#allocation2 + $0x88] sm:$0xff]  ;;  %v3851_v5 = vpack.c.bf16 %v31_v3, %v30_v2  ;;  %v32_v7 = vld [vmem:[#allocation2 + $0x10] sm:$0xff]  ;;  %v123_v10 = vld [vmem:[#allocation2 + $0x98] sm:$0xff]  ;;  %vm426_vm4 = vcmask 1041408   ;;  %vm399_vm5 = vcmask 15360   ;;  %vm422_vm6 = vcmask 277504  }
  0x15   :  { %v4599_v9 = vpack.c.bf16 %v122_v6, %v121_v4  ;;  %v124_v11 = vld [vmem:[#allocation2 + $0xa0] sm:$0xff]  ;;  %v3854_v12 = vpack.c.bf16 %v33_v8, %v32_v7  ;;  %v35_v15 = vld [vmem:[#allocation2 + $0x28] sm:$0xff]  ;;  %v126_v17 = vld [vmem:[#allocation2 + $0xb0] sm:$0xff]  ;;  %s4557_s29 = smov 64   ;;  %s4558_s30 = smov 32   ;;  %vm528_vm7 = vcmask 261120  }
  0x16   :  { %3852 = vmatpush3.bf16.msra.mxu0 %v3851_v5  ;;  %v4603_v13 = vpack.c.bf16 %v124_v11, %v123_v10  ;;  %v34_v14 = vld [vmem:[#allocation2 + $0x20] sm:$0xff]  ;;  %v125_v16 = vld [vmem:[#allocation2 + $0xa8] sm:$0xff]  ;;  %v36_v20 = vld [vmem:[#allocation2 + $0x30] sm:$0xff]  ;;  %s4559_s4 = smov 34   ;;  %vm129_vm8 = vcmask 523264   ;;  %vm3019_vm9 = vcmask 257024  }
  0x17   :  { %3876 = vmatpush3.bf16.msra.mxu1 %v4599_v9  ;;  %3853 = vmatprep.subr.bf16.mxu0 %v4554_v0  ;;  %v3857_v18 = vpack.c.bf16 %v35_v15, %v34_v14  ;;  %v4608_v19 = vpack.c.bf16 %v126_v17, %v125_v16  ;;  %v37_v21 = vld [vmem:[#allocation2 + $0x38] sm:$0xff]  ;;  %v128_v23 = vld [vmem:[#allocation2 + $0xc0] sm:$0xff]  ;;  %v39_v27 = vld [vmem:[#allocation2 + $0x48] sm:$0xff]  ;;  %vm3037_vm10 = vcmask 3072  }
  0x18   :  { %3877 = vmatprep.subr.bf16.mxu1 %v4554_v0  ;;  %v127_v22 = vld [vmem:[#allocation2 + $0xb8] sm:$0xff]  ;;  %v3860_v24 = vpack.c.bf16 %v37_v21, %v36_v20  ;;  %v38_v26 = vld [vmem:[#allocation2 + $0x40] sm:$0xff]  ;;  %v40_v29 = vld [vmem:[#allocation2 + $0x50] sm:$0xff] }
  0x19   :  { %v4613_v25 = vpack.c.bf16 %v128_v23, %v127_v22  ;;  %v3863_v28 = vpack.c.bf16 %v39_v27, %v38_v26  ;;  %v41_v30 = vld [vmem:[#allocation2 + $0x58] sm:$0xff]  ;;  %v42_v32 = vld [vmem:[#allocation2 + $0x60] sm:$0xff]  ;;  %v43_v33 = vld [vmem:[#allocation2 + $0x68] sm:$0xff] }
  0x1a   :  { %3855 = vmatpush3.bf16.msra.mxu0 %v3854_v12  ;;  %v3866_v31 = vpack.c.bf16 %v41_v30, %v40_v29  ;;  %v3869_v34 = vpack.c.bf16 %v43_v33, %v42_v32  ;;  %v44_v35 = vld [vmem:[#allocation2 + $0x70] sm:$0xff]  ;;  %v45_v36 = vld [vmem:[#allocation2 + $0x78] sm:$0xff]  ;;  %v4628_v38 = vld [vmem:[%s5313_s0] sm:$0xff] }
  0x1b   :  { %3879 = vmatpush3.bf16.msra.mxu1 %v4603_v13  ;;  %3856 = vmatprep.subr.bf16.mxu0 %v4554_v0  ;;  %v3872_v37 = vpack.c.bf16 %v45_v36, %v44_v35  ;;  %v214_v39 = vld [vmem:[#allocation2 + $0xd0] sm:$0xff]  ;;  %v215_v40 = vld [vmem:[#allocation2 + $0xd8] sm:$0xff]  ;;  %v216_v42 = vld [vmem:[#allocation2 + $0xe0] sm:$0xff] }
  0x1c   :  { %3880 = vmatprep.subr.bf16.mxu1 %v4554_v0  ;;  %v4632_v41 = vpack.c.bf16 %v215_v40, %v214_v39  ;;  %v217_v43 = vld [vmem:[#allocation2 + $0xe8] sm:$0xff]  ;;  %v218_v45 = vld [vmem:[#allocation2 + $0xf0] sm:$0xff]  ;;  %v219_v46 = vld [vmem:[#allocation2 + $0xf8] sm:$0xff] }
  0x1d   :  { %v4636_v44 = vpack.c.bf16 %v217_v43, %v216_v42  ;;  %v4640_v47 = vpack.c.bf16 %v219_v46, %v218_v45  ;;  %v220_v48 = vld [vmem:[#allocation2 + $0x100] sm:$0xff]  ;;  %v221_v49 = vld [vmem:[#allocation2 + $0x108] sm:$0xff]  ;;  %v222_v51 = vld [vmem:[#allocation2 + $0x110] sm:$0xff] }
  0x1e   :  { %3858 = vmatpush3.bf16.msra.mxu0 %v3857_v18  ;;  %v4644_v50 = vpack.c.bf16 %v221_v49, %v220_v48  ;;  %v223_v52 = vld [vmem:[#allocation2 + $0x118] sm:$0xff]  ;;  %v224_v54 = vld [vmem:[#allocation2 + $0x120] sm:$0xff]  ;;  %v225_v55 = vld [vmem:[#allocation2 + $0x128] sm:$0xff] }
  0x1f   :  { %3882 = vmatpush3.bf16.msra.mxu1 %v4608_v19  ;;  %3859 = vmatprep.subr.bf16.mxu0 %v4554_v0  ;;  %v4648_v53 = vpack.c.bf16 %v223_v52, %v222_v51  ;;  %v4652_v56 = vpack.c.bf16 %v225_v55, %v224_v54  ;;  %v226_v57 = vld [vmem:[#allocation2 + $0x130] sm:$0xff]  ;;  %v227_v58 = vld [vmem:[#allocation2 + $0x138] sm:$0xff]  ;;  %v228_v60 = vld [vmem:[#allocation2 + $0x140] sm:$0xff] }
  0x20   :  { %3883 = vmatprep.subr.bf16.mxu1 %v4554_v0  ;;  %v4655_v59 = vpack.c.bf16 %v227_v58, %v226_v57  ;;  %v229_v61 = vld [vmem:[#allocation2 + $0x148] sm:$0xff]  ;;  %v3044_v12 = vld [vmem:[#allocation2 + $0x80] ss:$0 sm:$0xff]  ;;  %v401_v21 = vld [vmem:[#allocation2 + $0x150] sm:$0xff] }
  0x21   :  { %v4659_v62 = vpack.c.bf16 %v229_v61, %v228_v60  ;;  %v4664_v63 = vld [vmem:[#allocation2 + $0xc8] sm:$0xf]  ;;  %v402_v22 = vld [vmem:[#allocation2 + $0x158] sm:$0xff]  ;;  %v403_v23 = vld [vmem:[#allocation2 + $0x160] sm:$0xff] }
  0x22   :  { %3861 = vmatpush3.bf16.msra.mxu0 %v3860_v24  ;;  %v4676_v24 = vpack.c.bf16 %v402_v22, %v401_v21  ;;  %v404_v26 = vld [vmem:[#allocation2 + $0x168] sm:$0xff]  ;;  %v406_v29 = vld [vmem:[#allocation2 + $0x178] sm:$0xff]  ;;  %v413_v61 = vld [vmem:[#allocation2 + $0x1b0] sm:$0xff] }
  0x23   :  { %3885 = vmatpush3.bf16.msra.mxu1 %v4613_v25  ;;  %3862 = vmatprep.subr.bf16.mxu0 %v4554_v0  ;;  %v4679_v27 = vpack.c.bf16 %v404_v26, %v403_v23  ;;  %v408_v32 = vld [vmem:[#allocation2 + $0x188] sm:$0xff]  ;;  %v410_v35 = vld [vmem:[#allocation2 + $0x198] sm:$0xff] }
  0x24   :  { %3886 = vmatprep.subr.bf16.mxu1 %v4554_v0  ;;  %v412_v39 = vld [vmem:[#allocation2 + $0x1a8] sm:$0xff] }
  0x26   :  { %3395 = vmatmul.mubr.f32.vlgmr.msra.gmra.mrb[0].mxu1 %v4556_v1  ;;  %3864 = vmatpush3.bf16.msra.mxu0 %v3863_v28  ;;  %v405_v28 = vld [vmem:[#allocation2 + $0x170] sm:$0xff] }
  0x27   :  { %3865 = vmatprep.subr.bf16.mxu0 %v4554_v0  ;;  %3429 = vmatprep.mubr.msk.f32.mxu1 %vm4555_vm0, %v4556_v1  ;;  %v4683_v30 = vpack.c.bf16 %v406_v29, %v405_v28 }
  0x28   :  { %3888 = vmatpush3.bf16.msra.mxu1 %v4632_v41 }
  0x29   :  { %3889 = vmatprep.subr.bf16.mxu1 %v4554_v0 }
  0x2a   :  { %3867 = vmatpush3.bf16.msra.mxu0 %v3866_v31  ;;  %v407_v31 = vld [vmem:[#allocation2 + $0x180] sm:$0xff] }
  0x2b   :  { %3868 = vmatprep.subr.bf16.mxu0 %v4554_v0  ;;  %v4687_v33 = vpack.c.bf16 %v408_v32, %v407_v31 }
  0x2c   :  { %3891 = vmatpush3.bf16.msra.mxu1 %v4636_v44 }
  0x2d   :  { %3892 = vmatprep.subr.bf16.mxu1 %v4554_v0 }
  0x2e   :  { %3870 = vmatpush3.bf16.msra.mxu0 %v3869_v34  ;;  %v409_v34 = vld [vmem:[#allocation2 + $0x190] sm:$0xff] }
  0x2f   :  { %3871 = vmatprep.subr.bf16.mxu0 %v4554_v0  ;;  %v4691_v36 = vpack.c.bf16 %v410_v35, %v409_v34 }
  0x30   :  { %3894 = vmatpush3.bf16.msra.mxu1 %v4640_v47 }
  0x31   :  { %3895 = vmatprep.subr.bf16.mxu1 %v4554_v0 }
  0x32   :  { %3873 = vmatpush3.bf16.msra.mxu0 %v3872_v37  ;;  %v411_v37 = vld [vmem:[#allocation2 + $0x1a0] sm:$0xff] }
  0x33   :  { %3910 = vmatprep.subr.bf16.mxu0 %v4554_v0  ;;  %v4695_v40 = vpack.c.bf16 %v412_v39, %v411_v37 }
  0x34   :  { %3897 = vmatpush3.bf16.msra.mxu1 %v4644_v50 }
  0x35   :  { %3376 = vmatmul.mubr.f32.vlgmr.msra.gmra.mrb[0].mxu0 %v4628_v38  ;;  %3898 = vmatprep.subr.bf16.mxu1 %v4554_v0 }
  0x36   :  { %3912 = vmatpush1.bf16.msra.mxu0 %v4676_v24 }
  0x37   :  { %3913 = vmatprep.subr.bf16.mxu0 %v4554_v0 }
  0x38   :  { %3900 = vmatpush3.bf16.msra.mxu1 %v4648_v53 }
  0x39   :  { %3901 = vmatprep.subr.bf16.mxu1 %v4554_v0 }
  0x3a   :  { %3915 = vmatpush1.bf16.msra.mxu0 %v4679_v27 }
  0x3b   :  { %3916 = vmatprep.subr.bf16.mxu0 %v4554_v0 }
  0x3c   :  { %3903 = vmatpush3.bf16.msra.mxu1 %v4652_v56 }
  0x3d   :  { %3904 = vmatprep.subr.bf16.mxu1 %v4554_v0 }
  0x3e   :  { %3918 = vmatpush1.bf16.msra.mxu0 %v4683_v30 }
  0x3f   :  { %3919 = vmatprep.subr.bf16.mxu0 %v4554_v0 }
  0x40   :  { %3906 = vmatpush3.bf16.msra.mxu1 %v4655_v59 }
  0x41   :  { %3907 = vmatprep.subr.bf16.mxu1 %v4554_v0 }
  0x42   :  { %3921 = vmatpush1.bf16.msra.mxu0 %v4687_v33 }
  0x43   :  { %3922 = vmatprep.subr.bf16.mxu0 %v4554_v0 }
  0x44   :  { %3909 = vmatpush3.bf16.msra.mxu1 %v4659_v62 }
  0x45   :  { %3432 = vmatprep.subr.mxu1 %v4556_v1 }
  0x46   :  { %3924 = vmatpush1.bf16.msra.mxu0 %v4691_v36 }
  0x47   :  { %3925 = vmatprep.subr.bf16.mxu0 %v4554_v0 }
  0x4a   :  { %3927 = vmatpush1.bf16.msra.mxu0 %v4695_v40 }
  0x4b   :  { %3928 = vmatprep.subr.bf16.mxu0 %v4554_v0 }
  0xf9   :  { %v199_v2 = vpop.f32.mrb[0].mxu1 }
  0xfa   :  { %v203_v3 = vmul.f32 %v199_v2, %v4664_v63  ;;  %v3396_v4 = vpop.f32.mrb[1].mxu1  ;;  %v414_v2 = vld [vmem:[#allocation2 + $0x1b8] sm:$0xff] }
  0xfb   :  { %v415_v4 = vld [vmem:[#allocation2 + $0x1c0] sm:$0xff] }
  0xfc   :  { %v205_v5 = vsel %vm204_vm1, %v203_v3, 0.0  ;;  %v4712_v3 = vpack.c.bf16 %v414_v2, %v413_v61  ;;  %v3053_v61 = vld [vmem:[%s5314_s1 + $0x4] sm:$0xf] }
  0xfd   :  { %v206_v6 = vrot.slane %v205_v5, 4  ;;  %v780_v2 = vsel %vm397_vm3, %v3053_v61, 1.0 }
  0xfe   :  { %3930 = vmatpush1.bf16.msra.mxu0 %v4712_v3 }
  0xff   :  { %v207_v7 = vadd.f32 %v206_v6, %v205_v5  ;;  %3931 = vmatprep.subr.bf16.mxu0 %v4554_v0  ;;  %v416_v5 = vld [vmem:[#allocation2 + $0x1c8] sm:$0xff] }
 0x100   :  { %v4716_v6 = vpack.c.bf16 %v416_v5, %v415_v4 }
 0x101   :  { %v208_v8 = vrot.slane %v207_v7, 2 }
 0x102   :  { %3933 = vmatpush1.bf16.msra.mxu0 %v4716_v6 }
 0x103   :  { %v209_v10 = vadd.f32 %v208_v8, %v207_v7  ;;  %3934 = vmatprep.subr.bf16.mxu0 %v4554_v0  ;;  %v417_v7 = vld [vmem:[#allocation2 + $0x1d0] sm:$0xff]  ;;  %v418_v8 = vld [vmem:[#allocation2 + $0x1d8] sm:$0xff] }
 0x105   :  { %v210_v11 = vrot.slane %v209_v10, 1 }
 0x107   :  { %v211_v15 = vadd.f32 %v210_v11, %v209_v10  ;;  %v4720_v10 = vpack.c.bf16 %v418_v8, %v417_v7  ;;  %v419_v11 = vld [vmem:[#allocation2 + $0x1e0] sm:$0xff] }
 0x108   :  { %v117_v14 = vpop.f32.mrb[0].mxu0 }
 0x109   :  { %v4668_v16 = vadd.f32 %v3044_v12, %v117_v14  ;;  %v3377_v17 = vpop.f32.mrb[1].mxu0  ;;  %3936 = vmatpush1.bf16.msra.mxu0 %v4720_v10  ;;  %v420_v12 = vld [vmem:[#allocation2 + $0x1e8] sm:$0xff] }
 0x10a   :  { %3937 = vmatprep.subr.bf16.mxu0 %v4554_v0  ;;  %v4724_v14 = vpack.c.bf16 %v420_v12, %v419_v11  ;;  %v4731_v17 = vld [vmem:[#allocation2 + $0x1f0] sm:$0x3] }
 0x10b   :  { %v212_v18 = vadd.f32 %v211_v15, %v4668_v16  ;;  %v396_v15 = vld [vmem:[%s5314_s1] sm:$0xf] }
 0x10d   :  { %4412 = vtanh.f32 %v212_v18  ;;  %3939 = vmatpush1.bf16.msra.mxu0 %v4724_v14  ;;  %v398_v18 = vsel %vm397_vm3, %v396_v15, 1.0 }
 0x10e   :  { %470 = vmatprep.subr.mxu0 %v4556_v1 }
 0x111   :  { %3047 = vmatpush1.msk.msra.mxu0 %vm426_vm4, %v4731_v17 }
 0x112   :  { %3976 = vmatprep.subr.bf16.mxu0 %v4554_v0 }
 0x117   :  { %v4413_v20 = vpop.eup %4412 }
 0x118   :  { %3430 = vmatmul.mubr.f32.vlgmr.msra.gmra.mrb[2].mxu1 %v4413_v20  ;;  %v400_v20 = vsel %vm399_vm5, %v398_v18, 0.0 }
 0x119   :  { %3433 = vmatpush3.msk.msra.mxu1 %vm204_vm1, %v4664_v63  ;;  %3434 = vmatprep.mubr.msk.f32.mxu1 %vm4555_vm0, %v4556_v1 }
 0x11a   :  { %3940 = vmatprep.subr.bf16.mxu1 %v4554_v0  ;;  %3048 = vmatprep.mubr.msk.f32.mxu0 %vm422_vm6, %v400_v20 }
 0x1eb   :  { %v296_v42 = vpop.f32.mrb[2].mxu1 }
 0x1ec   :  { %v300_v43 = vmul.f32 1.442695, %v296_v42  ;;  %v3431_v45 = vpop.f32.mrb[3].mxu1 }
 0x1ee   :  { %4414 = vpow2.f32 %v300_v43 }
 0x1f8   :  { %v4415_v46 = vpop.eup %4414 }
 0x1f9   :  { %v303_v48 = vsel %vm302_vm2, %v4415_v46, 0.0 }
 0x1fa   :  { %v304_v49 = vrot.slane %v303_v48, 4 }
 0x1fc   :  { %v305_v51 = vadd.f32 %v304_v49, %v303_v48 }
 0x1fe   :  { %v306_v52 = vrot.slane %v305_v51, 2 }
 0x200   :  { %v307_v54 = vadd.f32 %v306_v52, %v305_v51 }
 0x202   :  { %v308_v55 = vrot.slane %v307_v54, 1 }
 0x204   :  { %v309_v57 = vadd.f32 %v308_v55, %v307_v54 }
 0x206   :  { %4416 = vrcp.f32 %v309_v57 }
 0x210   :  { %v4417_v58 = vpop.eup %4416 }
 0x211   :  { %v311_v60 = vmul.f32 %v4417_v58, %v4415_v46 }
 0x213   :  { %3435 = vmatmul.mubr.msk.f32.vlgmr.msra.gmra.mrb[4].mxu1 %vm302_vm2, %v311_v60 }
 0x214   :  { %3942 = vmatpush3.bf16.msra.mxu1 %v4599_v9  ;;  %3453 = vmatprep.mubr.msk.f32.mxu1 %vm4555_vm0, %v4556_v1 }
 0x215   :  { %3943 = vmatprep.subr.bf16.mxu1 %v4554_v0 }
 0x218   :  { %3945 = vmatpush3.bf16.msra.mxu1 %v4603_v13 }
 0x219   :  { %3946 = vmatprep.subr.bf16.mxu1 %v4554_v0 }
 0x21c   :  { %3948 = vmatpush3.bf16.msra.mxu1 %v4608_v19 }
 0x21d   :  { %3949 = vmatprep.subr.bf16.mxu1 %v4554_v0 }
 0x220   :  { %3951 = vmatpush3.bf16.msra.mxu1 %v4613_v25 }
 0x221   :  { %3952 = vmatprep.subr.bf16.mxu1 %v4554_v0 }
 0x2e6   :  { %v384_v21 = vpop.f32.mrb[4].mxu1 }
 0x2e7   :  { %v388_v22 = vmul.f32 %v384_v21, %v4628_v38  ;;  %v3436_v23 = vpop.f32.mrb[5].mxu1 }
 0x2e9   :  { %v389_v26 = vrot.slane %v388_v22, 4 }
 0x2eb   :  { %v390_v28 = vadd.f32 %v389_v26, %v388_v22 }
 0x2ed   :  { %v391_v29 = vrot.slane %v390_v28, 2 }
 0x2ef   :  { %v392_v31 = vadd.f32 %v391_v29, %v390_v28 }
 0x2f1   :  { %v393_v32 = vrot.slane %v392_v31, 1 }
 0x2f3   :  { %v394_v34 = vadd.f32 %v393_v32, %v392_v31 }
 0x2f5   :  { %v395_v35 = vmul.f32 %v394_v34, %v4664_v63 }
 0x2f7   :  { %495 = vmatmul.mubr.f32.vlgmr.msra.gmra.mrb[2].mxu0 %v395_v35 }
 0x2f8   :  { %3978 = vmatpush1.bf16.msra.mxu0 %v4676_v24 }
 0x2f9   :  { %3979 = vmatprep.subr.bf16.mxu0 %v4554_v0 }
 0x2fc   :  { %3981 = vmatpush1.bf16.msra.mxu0 %v4679_v27 }
 0x2fd   :  { %3982 = vmatprep.subr.bf16.mxu0 %v4554_v0 }
 0x300   :  { %3984 = vmatpush1.bf16.msra.mxu0 %v4683_v30 }
 0x301   :  { %3985 = vmatprep.subr.bf16.mxu0 %v4554_v0 }
 0x304   :  { %3987 = vmatpush1.bf16.msra.mxu0 %v4687_v33 }
 0x305   :  { %3988 = vmatprep.subr.bf16.mxu0 %v4554_v0 }
 0x308   :  { %3990 = vmatpush1.bf16.msra.mxu0 %v4691_v36 }
 0x309   :  { %3991 = vmatprep.subr.bf16.mxu0 %v4554_v0 }
 0x30c   :  { %3993 = vmatpush1.bf16.msra.mxu0 %v4695_v40 }
 0x30d   :  { %3994 = vmatprep.subr.bf16.mxu0 %v4554_v0 }
 0x310   :  { %3996 = vmatpush1.bf16.msra.mxu0 %v4712_v3 }
 0x311   :  { %3997 = vmatprep.subr.bf16.mxu0 %v4554_v0 }
 0x314   :  { %3999 = vmatpush1.bf16.msra.mxu0 %v4716_v6 }
 0x315   :  { %4000 = vmatprep.subr.bf16.mxu0 %v4554_v0 }
 0x318   :  { %4002 = vmatpush1.bf16.msra.mxu0 %v4720_v10 }
 0x319   :  { %4003 = vmatprep.subr.bf16.mxu0 %v4554_v0 }
 0x31c   :  { %4005 = vmatpush1.bf16.msra.mxu0 %v4724_v14 }
 0x31d   :  { %825 = vmatprep.subr.mxu0 %v4556_v1 }
 0x320   :  { %3054 = vmatpush1.msk.msra.mxu0 %vm426_vm4, %v4731_v17 }
 0x321   :  { %3550 = vmatprep.subr.mxu0 %v4556_v1 }
 0x3ca   :  { %v496_v37 = vpop.f32.mrb[2].mxu0 }
 0x3cb   :  { %4418 = vtanh.f32 %v496_v37  ;;  %v498_v39 = vpop.f32.mrb[3].mxu0  ;;  %v3049_v43 = vmul.f32 -1.442695, %v496_v37 }
 0x3cd   :  { %4420 = vpow2.f32 %v3049_v43 }
 0x3d5   :  { %v4419_v42 = vpop.eup %4418 }
 0x3d6   :  { %509 = vrot.lane.b32.xlu0 %v4419_v42, %s4557_s29 }
 0x3d7   :  { %v4421_v45 = vpop.eup %4420 }
 0x3d8   :  { %v503_v46 = vadd.f32 1.0, %v4421_v45 }
 0x3da   :  { %4422 = vrcp.f32 %v503_v46 }
 0x3e4   :  { %v4423_v48 = vpop.eup %4422 }
 0x3e5   :  { %v507_v52 = vmul.f32 0.0, %v4423_v48 }
 0x448   :  { %v510_v49 = vpop.permute.xlu0 %509 }
 0x449   :  { %v512_v51 = vmul.f32 %v4423_v48, %v510_v49 }
 0x44b   :  { %514 = vrot.lane.b32.xlu0 %v512_v51, %s4558_s30 }
 0x4bd   :  { %v515_v54 = vpop.permute.xlu0 %514 }
 0x4be   :  { %v4766_v55 = vadd.f32 %v515_v54, %v507_v52 }
 0x4c0   :  { %4424 = vtanh.f32 %v4766_v55 }
 0x4ca   :  { %v4425_v57 = vpop.eup %4424 }
 0x4cb   :  { %520 = vrot.lane.b32.xlu1 %v4425_v57, %s4557_s29 }
 0x53d   :  { %v521_v58 = vpop.permute.xlu1 %520 }
 0x53e   :  { %v523_v60 = vmul.f32 %v4423_v48, %v521_v58 }
 0x540   :  { %777 = vrot.lane.b32.xlu0 %v523_v60, %s4559_s4  ;;  %525 = vrot.lane.b32.xlu1 %v523_v60, %s4558_s30 }
 0x5b2   :  { %v778_v4 = vpop.permute.xlu0 %777  ;;  %v526_v5 = vpop.permute.xlu1 %525 }
 0x5b3   :  { %v781_v7 = vsel %vm399_vm5, %v780_v2, %v778_v4  ;;  %v529_v8 = vsel %vm528_vm7, %v526_v5, %v4766_v55 }
 0x5b4   :  { %3454 = vmatmul.mubr.msk.f32.vlgmr.msra.gmra.mrb[6].mxu1 %vm129_vm8, %v529_v8  ;;  %3055 = vmatprep.mubr.msk.f32.mxu0 %vm422_vm6, %v781_v7 }
 0x5b5   :  { %3954 = vmatpush3.bf16.msra.mxu1 %v4632_v41  ;;  %3488 = vmatprep.mubr.msk.f32.mxu1 %vm4555_vm0, %v4556_v1 }
 0x5b6   :  { %3955 = vmatprep.subr.bf16.mxu1 %v4554_v0 }
 0x5b9   :  { %3957 = vmatpush3.bf16.msra.mxu1 %v4636_v44 }
 0x5ba   :  { %3958 = vmatprep.subr.bf16.mxu1 %v4554_v0 }
 0x5bd   :  { %3960 = vmatpush3.bf16.msra.mxu1 %v4640_v47 }
 0x5be   :  { %3961 = vmatprep.subr.bf16.mxu1 %v4554_v0 }
 0x5c1   :  { %3963 = vmatpush3.bf16.msra.mxu1 %v4644_v50 }
 0x5c2   :  { %3964 = vmatprep.subr.bf16.mxu1 %v4554_v0 }
 0x5c5   :  { %3966 = vmatpush3.bf16.msra.mxu1 %v4648_v53 }
 0x5c6   :  { %3967 = vmatprep.subr.bf16.mxu1 %v4554_v0 }
 0x5c9   :  { %3969 = vmatpush3.bf16.msra.mxu1 %v4652_v56 }
 0x5ca   :  { %3970 = vmatprep.subr.bf16.mxu1 %v4554_v0 }
 0x5cd   :  { %3972 = vmatpush3.bf16.msra.mxu1 %v4655_v59 }
 0x5ce   :  { %3973 = vmatprep.subr.bf16.mxu1 %v4554_v0 }
 0x5d1   :  { %3975 = vmatpush3.bf16.msra.mxu1 %v4659_v62 }
 0x5d2   :  { %3491 = vmatprep.subr.mxu1 %v4556_v1 }
 0x687   :  { %v599_v11 = vpop.f32.mrb[6].mxu1 }
 0x688   :  { %v603_v12 = vmul.f32 %v599_v11, %v4664_v63  ;;  %v3455_v15 = vpop.f32.mrb[7].mxu1 }
 0x68a   :  { %v604_v18 = vsel %vm204_vm1, %v603_v12, 0.0 }
 0x68b   :  { %v605_v20 = vrot.slane %v604_v18, 4 }
 0x68d   :  { %v606_v21 = vadd.f32 %v605_v20, %v604_v18 }
 0x68f   :  { %v607_v22 = vrot.slane %v606_v21, 2 }
 0x691   :  { %v608_v23 = vadd.f32 %v607_v22, %v606_v21 }
 0x693   :  { %v609_v26 = vrot.slane %v608_v23, 1 }
 0x695   :  { %v610_v28 = vadd.f32 %v609_v26, %v608_v23 }
 0x697   :  { %v611_v29 = vadd.f32 %v610_v28, %v4668_v16 }
 0x699   :  { %4426 = vtanh.f32 %v611_v29 }
 0x6a3   :  { %v4427_v31 = vpop.eup %4426 }
 0x6a4   :  { %3489 = vmatmul.mubr.f32.vlgmr.msra.gmra.mrb[8].mxu1 %v4427_v31 }
 0x6a5   :  { %3492 = vmatpush3.msk.msra.mxu1 %vm204_vm1, %v4664_v63  ;;  %3493 = vmatprep.mubr.msk.f32.mxu1 %vm4555_vm0, %v4556_v1 }
 0x6a6   :  { %4006 = vmatprep.subr.bf16.mxu1 %v4554_v0 }
 0x777   :  { %v679_v32 = vpop.f32.mrb[8].mxu1 }
 0x778   :  { %v683_v34 = vmul.f32 1.442695, %v679_v32  ;;  %v3490_v35 = vpop.f32.mrb[9].mxu1 }
 0x77a   :  { %4428 = vpow2.f32 %v683_v34 }
 0x784   :  { %v4429_v37 = vpop.eup %4428 }
 0x785   :  { %v685_v39 = vsel %vm302_vm2, %v4429_v37, 0.0 }
 0x786   :  { %v686_v42 = vrot.slane %v685_v39, 4 }
 0x788   :  { %v687_v43 = vadd.f32 %v686_v42, %v685_v39 }
 0x78a   :  { %v688_v45 = vrot.slane %v687_v43, 2 }
 0x78c   :  { %v689_v46 = vadd.f32 %v688_v45, %v687_v43 }
 0x78e   :  { %v690_v48 = vrot.slane %v689_v46, 1 }
 0x790   :  { %v691_v49 = vadd.f32 %v690_v48, %v689_v46 }
 0x792   :  { %4430 = vrcp.f32 %v691_v49 }
 0x79c   :  { %v4431_v51 = vpop.eup %4430 }
 0x79d   :  { %v693_v52 = vmul.f32 %v4431_v51, %v4429_v37 }
 0x79f   :  { %3494 = vmatmul.mubr.msk.f32.vlgmr.msra.gmra.mrb[10].mxu1 %vm302_vm2, %v693_v52 }
 0x7a0   :  { %4008 = vmatpush3.bf16.msra.mxu1 %v4599_v9  ;;  %3512 = vmatprep.mubr.msk.f32.mxu1 %vm4555_vm0, %v4556_v1 }
 0x7a1   :  { %4009 = vmatprep.subr.bf16.mxu1 %v4554_v0 }
 0x7a4   :  { %4011 = vmatpush3.bf16.msra.mxu1 %v4603_v13 }
 0x7a5   :  { %4012 = vmatprep.subr.bf16.mxu1 %v4554_v0 }
 0x7a8   :  { %4014 = vmatpush3.bf16.msra.mxu1 %v4608_v19 }
 0x7a9   :  { %4015 = vmatprep.subr.bf16.mxu1 %v4554_v0 }
 0x7ac   :  { %4017 = vmatpush3.bf16.msra.mxu1 %v4613_v25 }
 0x7ad   :  { %4018 = vmatprep.subr.bf16.mxu1 %v4554_v0 }
 0x872   :  { %v763_v54 = vpop.f32.mrb[10].mxu1 }
 0x873   :  { %v767_v57 = vmul.f32 %v763_v54, %v4628_v38  ;;  %v3495_v58 = vpop.f32.mrb[11].mxu1 }
 0x875   :  { %v768_v60 = vrot.slane %v767_v57, 4 }
 0x877   :  { %v769_v61 = vadd.f32 %v768_v60, %v767_v57 }
 0x879   :  { %v770_v2 = vrot.slane %v769_v61, 2 }
 0x87b   :  { %v771_v4 = vadd.f32 %v770_v2, %v769_v61 }
 0x87d   :  { %v772_v5 = vrot.slane %v771_v4, 1 }
 0x87f   :  { %v773_v7 = vadd.f32 %v772_v5, %v771_v4 }
 0x881   :  { %v774_v8 = vmul.f32 %v773_v7, %v4664_v63 }
 0x883   :  { %850 = vmatmul.mubr.f32.vlgmr.msra.gmra.mrb[4].mxu0 %v774_v8 }
 0x884   :  { %3551 = vmatpush3.msk.msra.mxu0 %vm204_vm1, %v4664_v63  ;;  %3552 = vmatprep.mubr.msk.f32.mxu0 %vm4555_vm0, %v4556_v1 }
 0x885   :  { %4042 = vmatprep.subr.bf16.mxu0 %v4554_v0 }
 0x956   :  { %v851_v11 = vpop.f32.mrb[4].mxu0 }
 0x957   :  { %4432 = vtanh.f32 %v851_v11  ;;  %v853_v12 = vpop.f32.mrb[5].mxu0  ;;  %v3056_v18 = vmul.f32 -1.442695, %v851_v11 }
 0x959   :  { %4434 = vpow2.f32 %v3056_v18 }
 0x961   :  { %v4433_v15 = vpop.eup %4432 }
 0x962   :  { %864 = vrot.lane.b32.xlu1 %v4433_v15, %s4557_s29 }
 0x963   :  { %v4435_v20 = vpop.eup %4434 }
 0x964   :  { %v858_v21 = vadd.f32 1.0, %v4435_v20  ;;  %v3060_v20 = vld [vmem:[%s5314_s1 + $0x8] sm:$0xf] }
 0x966   :  { %4436 = vrcp.f32 %v858_v21 }
 0x970   :  { %v4437_v22 = vpop.eup %4436 }
 0x971   :  { %v862_v28 = vmul.f32 %v4437_v22, %v4766_v55 }
 0x9d4   :  { %v865_v23 = vpop.permute.xlu1 %864 }
 0x9d5   :  { %v867_v26 = vmul.f32 %v4437_v22, %v865_v23 }
 0x9d7   :  { %869 = vrot.lane.b32.xlu0 %v867_v26, %s4558_s30 }
 0xa49   :  { %v870_v29 = vpop.permute.xlu0 %869 }
 0xa4a   :  { %v4829_v31 = vadd.f32 %v870_v29, %v862_v28 }
 0xa4c   :  { %4438 = vtanh.f32 %v4829_v31 }
 0xa56   :  { %v4439_v32 = vpop.eup %4438 }
 0xa57   :  { %875 = vrot.lane.b32.xlu1 %v4439_v32, %s4557_s29 }
 0xac9   :  { %v876_v34 = vpop.permute.xlu1 %875 }
 0xaca   :  { %v878_v35 = vmul.f32 %v4437_v22, %v876_v34  ;;  %v1134_v22 = vsel %vm397_vm3, %v3060_v20, 1.0 }
 0xacc   :  { %1131 = vrot.lane.b32.xlu1 %v878_v35, %s4559_s4  ;;  %880 = vrot.lane.b32.xlu0 %v878_v35, %s4558_s30 }
 0xb3e   :  { %v881_v37 = vpop.permute.xlu0 %880  ;;  %v1132_v23 = vpop.permute.xlu1 %1131 }
 0xb3f   :  { %v883_v39 = vsel %vm528_vm7, %v881_v37, %v4829_v31  ;;  %v1135_v28 = vsel %vm399_vm5, %v1134_v22, %v1132_v23 }
 0xb40   :  { %3513 = vmatmul.mubr.msk.f32.vlgmr.msra.gmra.mrb[12].mxu1 %vm129_vm8, %v883_v39 }
 0xb41   :  { %4020 = vmatpush3.bf16.msra.mxu1 %v4632_v41  ;;  %3547 = vmatprep.mubr.msk.f32.mxu1 %vm4555_vm0, %v4556_v1 }
 0xb42   :  { %4021 = vmatprep.subr.bf16.mxu1 %v4554_v0 }
 0xb45   :  { %4023 = vmatpush3.bf16.msra.mxu1 %v4636_v44 }
 0xb46   :  { %4024 = vmatprep.subr.bf16.mxu1 %v4554_v0 }
 0xb49   :  { %4026 = vmatpush3.bf16.msra.mxu1 %v4640_v47 }
 0xb4a   :  { %4027 = vmatprep.subr.bf16.mxu1 %v4554_v0 }
 0xb4d   :  { %4029 = vmatpush3.bf16.msra.mxu1 %v4644_v50 }
 0xb4e   :  { %4030 = vmatprep.subr.bf16.mxu1 %v4554_v0 }
 0xb51   :  { %4032 = vmatpush3.bf16.msra.mxu1 %v4648_v53 }
 0xb52   :  { %4033 = vmatprep.subr.bf16.mxu1 %v4554_v0 }
 0xb55   :  { %4035 = vmatpush3.bf16.msra.mxu1 %v4652_v56 }
 0xb56   :  { %4036 = vmatprep.subr.bf16.mxu1 %v4554_v0 }
 0xb59   :  { %4038 = vmatpush3.bf16.msra.mxu1 %v4655_v59 }
 0xb5a   :  { %4039 = vmatprep.subr.bf16.mxu1 %v4554_v0 }
 0xb5d   :  { %4041 = vmatpush3.bf16.msra.mxu1 %v4659_v62 }
 0xb5e   :  { %4072 = vmatprep.subr.bf16.mxu1 %v4554_v0 }
 0xc13   :  { %v953_v55 = vpop.f32.mrb[12].mxu1 }
 0xc14   :  { %v957_v42 = vmul.f32 %v953_v55, %v4664_v63  ;;  %v3514_v43 = vpop.f32.mrb[13].mxu1 }
 0xc16   :  { %v958_v45 = vsel %vm204_vm1, %v957_v42, 0.0 }
 0xc17   :  { %v959_v46 = vrot.slane %v958_v45, 4 }
 0xc19   :  { %v960_v48 = vadd.f32 %v959_v46, %v958_v45 }
 0xc1b   :  { %v961_v49 = vrot.slane %v960_v48, 2 }
 0xc1d   :  { %v962_v51 = vadd.f32 %v961_v49, %v960_v48 }
 0xc1f   :  { %v963_v52 = vrot.slane %v962_v51, 1 }
 0xc21   :  { %v964_v54 = vadd.f32 %v963_v52, %v962_v51 }
 0xc23   :  { %v965_v57 = vadd.f32 %v964_v54, %v4668_v16 }
 0xc25   :  { %4440 = vtanh.f32 %v965_v57 }
 0xc2f   :  { %v4441_v58 = vpop.eup %4440 }
 0xc30   :  { %3548 = vmatmul.mubr.f32.vlgmr.msra.gmra.mrb[14].mxu1 %v4441_v58 }
 0xc31   :  { %4074 = vmatpush3.bf16.msra.mxu1 %v4599_v9  ;;  %3571 = vmatprep.mubr.msk.f32.mxu1 %vm4555_vm0, %v4556_v1 }
 0xc32   :  { %4075 = vmatprep.subr.bf16.mxu1 %v4554_v0 }
 0xc35   :  { %4077 = vmatpush3.bf16.msra.mxu1 %v4603_v13 }
 0xc36   :  { %4078 = vmatprep.subr.bf16.mxu1 %v4554_v0 }
 0xc39   :  { %4080 = vmatpush3.bf16.msra.mxu1 %v4608_v19 }
 0xc3a   :  { %4081 = vmatprep.subr.bf16.mxu1 %v4554_v0 }
 0xc3d   :  { %4083 = vmatpush3.bf16.msra.mxu1 %v4613_v25 }
 0xc3e   :  { %4084 = vmatprep.subr.bf16.mxu1 %v4554_v0 }
 0xd03   :  { %v1033_v60 = vpop.f32.mrb[14].mxu1 }
 0xd04   :  { %v1037_v61 = vmul.f32 1.442695, %v1033_v60  ;;  %v3549_v2 = vpop.f32.mrb[15].mxu1 }
 0xd06   :  { %4442 = vpow2.f32 %v1037_v61 }
 0xd10   :  { %v4443_v4 = vpop.eup %4442 }
 0xd11   :  { %v1039_v5 = vsel %vm302_vm2, %v4443_v4, 0.0 }
 0xd12   :  { %v1040_v7 = vrot.slane %v1039_v5, 4 }
 0xd14   :  { %v1041_v8 = vadd.f32 %v1040_v7, %v1039_v5 }
 0xd16   :  { %v1042_v11 = vrot.slane %v1041_v8, 2 }
 0xd18   :  { %v1043_v12 = vadd.f32 %v1042_v11, %v1041_v8 }
 0xd1a   :  { %v1044_v15 = vrot.slane %v1043_v12, 1 }
 0xd1c   :  { %v1045_v18 = vadd.f32 %v1044_v15, %v1043_v12 }
 0xd1e   :  { %4444 = vrcp.f32 %v1045_v18 }
 0xd28   :  { %v4445_v21 = vpop.eup %4444 }
 0xd29   :  { %v1047_v26 = vmul.f32 %v4445_v21, %v4443_v4 }
 0xd2b   :  { %3553 = vmatmul.mubr.msk.f32.vlgmr.msra.gmra.mrb[6].mxu0 %vm302_vm2, %v1047_v26 }
 0xd2c   :  { %3062 = vmatprep.mubr.msk.f32.mxu0 %vm422_vm6, %v1135_v28  ;;  %4044 = vmatpush1.bf16.msra.mxu0 %v4676_v24 }
 0xd2d   :  { %4045 = vmatprep.subr.bf16.mxu0 %v4554_v0 }
 0xd30   :  { %4047 = vmatpush1.bf16.msra.mxu0 %v4679_v27 }
 0xd31   :  { %4048 = vmatprep.subr.bf16.mxu0 %v4554_v0 }
 0xd34   :  { %4050 = vmatpush1.bf16.msra.mxu0 %v4683_v30 }
 0xd35   :  { %4051 = vmatprep.subr.bf16.mxu0 %v4554_v0 }
 0xd38   :  { %4053 = vmatpush1.bf16.msra.mxu0 %v4687_v33 }
 0xd39   :  { %4054 = vmatprep.subr.bf16.mxu0 %v4554_v0 }
 0xd3c   :  { %4056 = vmatpush1.bf16.msra.mxu0 %v4691_v36 }
 0xd3d   :  { %4057 = vmatprep.subr.bf16.mxu0 %v4554_v0 }
 0xd40   :  { %4059 = vmatpush1.bf16.msra.mxu0 %v4695_v40 }
 0xd41   :  { %4060 = vmatprep.subr.bf16.mxu0 %v4554_v0 }
 0xd44   :  { %4062 = vmatpush1.bf16.msra.mxu0 %v4712_v3 }
 0xd45   :  { %4063 = vmatprep.subr.bf16.mxu0 %v4554_v0 }
 0xd48   :  { %4065 = vmatpush1.bf16.msra.mxu0 %v4716_v6 }
 0xd49   :  { %4066 = vmatprep.subr.bf16.mxu0 %v4554_v0 }
 0xd4c   :  { %4068 = vmatpush1.bf16.msra.mxu0 %v4720_v10 }
 0xd4d   :  { %4069 = vmatprep.subr.bf16.mxu0 %v4554_v0 }
 0xd50   :  { %4071 = vmatpush1.bf16.msra.mxu0 %v4724_v14 }
 0xd51   :  { %1179 = vmatprep.subr.mxu0 %v4556_v1 }
 0xd54   :  { %3061 = vmatpush1.msk.msra.mxu0 %vm426_vm4, %v4731_v17 }
 0xd55   :  { %3609 = vmatprep.subr.mxu0 %v4556_v1 }
 0xdfe   :  { %v1117_v29 = vpop.f32.mrb[6].mxu0 }
 0xdff   :  { %v1121_v32 = vmul.f32 %v1117_v29, %v4628_v38  ;;  %v3554_v34 = vpop.f32.mrb[7].mxu0 }
 0xe01   :  { %v1122_v35 = vrot.slane %v1121_v32, 4 }
 0xe03   :  { %v1123_v37 = vadd.f32 %v1122_v35, %v1121_v32 }
 0xe05   :  { %v1124_v39 = vrot.slane %v1123_v37, 2 }
 0xe07   :  { %v1125_v55 = vadd.f32 %v1124_v39, %v1123_v37 }
 0xe09   :  { %v1126_v42 = vrot.slane %v1125_v55, 1 }
 0xe0b   :  { %v1127_v43 = vadd.f32 %v1126_v42, %v1125_v55 }
 0xe0d   :  { %v1128_v45 = vmul.f32 %v1127_v43, %v4664_v63 }
 0xe0f   :  { %1204 = vmatmul.mubr.f32.vlgmr.msra.gmra.mrb[8].mxu0 %v1128_v45 }
 0xe10   :  { %3610 = vmatpush3.msk.msra.mxu0 %vm204_vm1, %v4664_v63  ;;  %3611 = vmatprep.mubr.msk.f32.mxu0 %vm4555_vm0, %v4556_v1 }
 0xe11   :  { %4108 = vmatprep.subr.bf16.mxu0 %v4554_v0 }
 0xee2   :  { %v1205_v46 = vpop.f32.mrb[8].mxu0 }
 0xee3   :  { %4446 = vtanh.f32 %v1205_v46  ;;  %v1207_v38 = vpop.f32.mrb[9].mxu0  ;;  %v3063_v49 = vmul.f32 -1.442695, %v1205_v46 }
 0xee5   :  { %4448 = vpow2.f32 %v3063_v49  ;;  %v3067_v49 = vld [vmem:[%s5314_s1 + $0xc] sm:$0xf] }
 0xeed   :  { %v4447_v48 = vpop.eup %4446 }
 0xeee   :  { %1218 = vrot.lane.b32.xlu0 %v4447_v48, %s4557_s29 }
 0xeef   :  { %v4449_v51 = vpop.eup %4448 }
 0xef0   :  { %v1212_v52 = vadd.f32 1.0, %v4449_v51 }
 0xef2   :  { %4450 = vrcp.f32 %v1212_v52  ;;  %v1488_v52 = vsel %vm397_vm3, %v3067_v49, 1.0 }
 0xefc   :  { %v4451_v54 = vpop.eup %4450 }
 0xefd   :  { %v1216_v60 = vmul.f32 %v4451_v54, %v4829_v31 }
 0xf60   :  { %v1219_v57 = vpop.permute.xlu0 %1218 }
 0xf61   :  { %v1221_v58 = vmul.f32 %v4451_v54, %v1219_v57 }
 0xf63   :  { %1223 = vrot.lane.b32.xlu1 %v1221_v58, %s4558_s30 }
 0xfd5   :  { %v1224_v61 = vpop.permute.xlu1 %1223 }
 0xfd6   :  { %v4910_v2 = vadd.f32 %v1224_v61, %v1216_v60  ;;  %v4984_v61 = vld [vmem:[%s5313_s0] sm:$0xff] }
 0xfd8   :  { %4452 = vtanh.f32 %v4910_v2 }
 0xfe2   :  { %v4453_v4 = vpop.eup %4452 }
 0xfe3   :  { %1229 = vrot.lane.b32.xlu0 %v4453_v4, %s4557_s29 }
0x1055   :  { %v1230_v5 = vpop.permute.xlu0 %1229 }
0x1056   :  { %v1232_v7 = vmul.f32 %v4451_v54, %v1230_v5 }
0x1058   :  { %1485 = vrot.lane.b32.xlu0 %v1232_v7, %s4559_s4  ;;  %1234 = vrot.lane.b32.xlu1 %v1232_v7, %s4558_s30 }
0x10ca   :  { %v1235_v8 = vpop.permute.xlu1 %1234  ;;  %v1486_v54 = vpop.permute.xlu0 %1485 }
0x10cb   :  { %v1237_v11 = vsel %vm528_vm7, %v1235_v8, %v4910_v2  ;;  %v1489_v58 = vsel %vm399_vm5, %v1488_v52, %v1486_v54 }
0x10cc   :  { %3572 = vmatmul.mubr.msk.f32.vlgmr.msra.gmra.mrb[16].mxu1 %vm129_vm8, %v1237_v11 }
0x10cd   :  { %4086 = vmatpush3.bf16.msra.mxu1 %v4632_v41  ;;  %3606 = vmatprep.mubr.msk.f32.mxu1 %vm4555_vm0, %v4556_v1 }
0x10ce   :  { %4087 = vmatprep.subr.bf16.mxu1 %v4554_v0 }
0x10d1   :  { %4089 = vmatpush3.bf16.msra.mxu1 %v4636_v44 }
0x10d2   :  { %4090 = vmatprep.subr.bf16.mxu1 %v4554_v0 }
0x10d5   :  { %4092 = vmatpush3.bf16.msra.mxu1 %v4640_v47 }
0x10d6   :  { %4093 = vmatprep.subr.bf16.mxu1 %v4554_v0 }
0x10d9   :  { %4095 = vmatpush3.bf16.msra.mxu1 %v4644_v50 }
0x10da   :  { %4096 = vmatprep.subr.bf16.mxu1 %v4554_v0 }
0x10dd   :  { %4098 = vmatpush3.bf16.msra.mxu1 %v4648_v53 }
0x10de   :  { %4099 = vmatprep.subr.bf16.mxu1 %v4554_v0 }
0x10e1   :  { %4101 = vmatpush3.bf16.msra.mxu1 %v4652_v56 }
0x10e2   :  { %4102 = vmatprep.subr.bf16.mxu1 %v4554_v0 }
0x10e5   :  { %4104 = vmatpush3.bf16.msra.mxu1 %v4655_v59 }
0x10e6   :  { %4105 = vmatprep.subr.bf16.mxu1 %v4554_v0 }
0x10e9   :  { %4107 = vmatpush3.bf16.msra.mxu1 %v4659_v62 }
0x10ea   :  { %4138 = vmatprep.subr.bf16.mxu1 %v4554_v0 }
0x119f   :  { %v1307_v31 = vpop.f32.mrb[16].mxu1 }
0x11a0   :  { %v1311_v12 = vmul.f32 %v1307_v31, %v4664_v63  ;;  %v3573_v15 = vpop.f32.mrb[17].mxu1 }
0x11a2   :  { %v1312_v18 = vsel %vm204_vm1, %v1311_v12, 0.0 }
0x11a3   :  { %v1313_v20 = vrot.slane %v1312_v18, 4 }
0x11a5   :  { %v1314_v21 = vadd.f32 %v1313_v20, %v1312_v18 }
0x11a7   :  { %v1315_v22 = vrot.slane %v1314_v21, 2 }
0x11a9   :  { %v1316_v23 = vadd.f32 %v1315_v22, %v1314_v21 }
0x11ab   :  { %v1317_v26 = vrot.slane %v1316_v23, 1 }
0x11ad   :  { %v1318_v28 = vadd.f32 %v1317_v26, %v1316_v23 }
0x11af   :  { %v1319_v29 = vadd.f32 %v1318_v28, %v4668_v16 }
0x11b1   :  { %4454 = vtanh.f32 %v1319_v29 }
0x11bb   :  { %v4455_v32 = vpop.eup %4454 }
0x11bc   :  { %3607 = vmatmul.mubr.f32.vlgmr.msra.gmra.mrb[18].mxu1 %v4455_v32 }
0x11bd   :  { %4140 = vmatpush3.bf16.msra.mxu1 %v4599_v9  ;;  %3630 = vmatprep.mubr.msk.f32.mxu1 %vm4555_vm0, %v4556_v1 }
0x11be   :  { %4141 = vmatprep.subr.bf16.mxu1 %v4554_v0 }
0x11c1   :  { %4143 = vmatpush3.bf16.msra.mxu1 %v4603_v13 }
0x11c2   :  { %4144 = vmatprep.subr.bf16.mxu1 %v4554_v0 }
0x11c5   :  { %4146 = vmatpush3.bf16.msra.mxu1 %v4608_v19 }
0x11c6   :  { %4147 = vmatprep.subr.bf16.mxu1 %v4554_v0 }
0x11c9   :  { %4149 = vmatpush3.bf16.msra.mxu1 %v4613_v25 }
0x11ca   :  { %4150 = vmatprep.subr.bf16.mxu1 %v4554_v0 }
0x128f   :  { %v1387_v34 = vpop.f32.mrb[18].mxu1 }
0x1290   :  { %v1391_v35 = vmul.f32 1.442695, %v1387_v34  ;;  %v3608_v37 = vpop.f32.mrb[19].mxu1 }
0x1292   :  { %4456 = vpow2.f32 %v1391_v35 }
0x129c   :  { %v4457_v39 = vpop.eup %4456 }
0x129d   :  { %v1393_v55 = vsel %vm302_vm2, %v4457_v39, 0.0 }
0x129e   :  { %v1394_v42 = vrot.slane %v1393_v55, 4 }
0x12a0   :  { %v1395_v43 = vadd.f32 %v1394_v42, %v1393_v55 }
0x12a2   :  { %v1396_v45 = vrot.slane %v1395_v43, 2 }
0x12a4   :  { %v1397_v46 = vadd.f32 %v1396_v45, %v1395_v43 }
0x12a6   :  { %v1398_v38 = vrot.slane %v1397_v46, 1 }
0x12a8   :  { %v1399_v48 = vadd.f32 %v1398_v38, %v1397_v46  ;;  %v5023_v46 = vld [vmem:[#allocation2 + $0xc8] sm:$0xf] }
0x12aa   :  { %4458 = vrcp.f32 %v1399_v48 }
0x12b4   :  { %v4459_v51 = vpop.eup %4458 }
0x12b5   :  { %v1401_v57 = vmul.f32 %v4459_v51, %v4457_v39 }
0x12b7   :  { %3612 = vmatmul.mubr.msk.f32.vlgmr.msra.gmra.mrb[10].mxu0 %vm302_vm2, %v1401_v57 }
0x12b8   :  { %3069 = vmatprep.mubr.msk.f32.mxu0 %vm422_vm6, %v1489_v58  ;;  %4110 = vmatpush1.bf16.msra.mxu0 %v4676_v24 }
0x12b9   :  { %4111 = vmatprep.subr.bf16.mxu0 %v4554_v0 }
0x12bc   :  { %4113 = vmatpush1.bf16.msra.mxu0 %v4679_v27 }
0x12bd   :  { %4114 = vmatprep.subr.bf16.mxu0 %v4554_v0 }
0x12c0   :  { %4116 = vmatpush1.bf16.msra.mxu0 %v4683_v30 }
0x12c1   :  { %4117 = vmatprep.subr.bf16.mxu0 %v4554_v0 }
0x12c4   :  { %4119 = vmatpush1.bf16.msra.mxu0 %v4687_v33 }
0x12c5   :  { %4120 = vmatprep.subr.bf16.mxu0 %v4554_v0 }
0x12c8   :  { %4122 = vmatpush1.bf16.msra.mxu0 %v4691_v36 }
0x12c9   :  { %4123 = vmatprep.subr.bf16.mxu0 %v4554_v0 }
0x12cc   :  { %4125 = vmatpush1.bf16.msra.mxu0 %v4695_v40 }
0x12cd   :  { %4126 = vmatprep.subr.bf16.mxu0 %v4554_v0 }
0x12d0   :  { %4128 = vmatpush1.bf16.msra.mxu0 %v4712_v3 }
0x12d1   :  { %4129 = vmatprep.subr.bf16.mxu0 %v4554_v0 }
0x12d4   :  { %4131 = vmatpush1.bf16.msra.mxu0 %v4716_v6 }
0x12d5   :  { %4132 = vmatprep.subr.bf16.mxu0 %v4554_v0 }
0x12d8   :  { %4134 = vmatpush1.bf16.msra.mxu0 %v4720_v10 }
0x12d9   :  { %4135 = vmatprep.subr.bf16.mxu0 %v4554_v0 }
0x12dc   :  { %4137 = vmatpush1.bf16.msra.mxu0 %v4724_v14 }
0x12dd   :  { %1533 = vmatprep.subr.mxu0 %v4556_v1 }
0x12e0   :  { %3068 = vmatpush1.msk.msra.mxu0 %vm426_vm4, %v4731_v17 }
0x12e1   :  { %3668 = vmatprep.subr.mxu0 %v4556_v1 }
0x138a   :  { %v1471_v60 = vpop.f32.mrb[10].mxu0 }
0x138b   :  { %v1475_v4 = vmul.f32 %v4984_v61, %v1471_v60  ;;  %v3613_v5 = vpop.f32.mrb[11].mxu0 }
0x138d   :  { %v1476_v7 = vrot.slane %v1475_v4, 4 }
0x138f   :  { %v1477_v8 = vadd.f32 %v1476_v7, %v1475_v4 }
0x1391   :  { %v1478_v11 = vrot.slane %v1477_v8, 2 }
0x1393   :  { %v1479_v31 = vadd.f32 %v1478_v11, %v1477_v8 }
0x1395   :  { %v1480_v12 = vrot.slane %v1479_v31, 1 }
0x1397   :  { %v1481_v15 = vadd.f32 %v1480_v12, %v1479_v31 }
0x1399   :  { %v1482_v18 = vmul.f32 %v1481_v15, %v4664_v63 }
0x139b   :  { %1558 = vmatmul.mubr.f32.vlgmr.msra.gmra.mrb[12].mxu0 %v1482_v18 }
0x139c   :  { %3669 = vmatpush3.msk.msra.mxu0 %vm204_vm1, %v4664_v63  ;;  %3670 = vmatprep.mubr.msk.f32.mxu0 %vm4555_vm0, %v4556_v1 }
0x139d   :  { %4174 = vmatprep.subr.bf16.mxu0 %v4554_v0 }
0x146e   :  { %v1559_v20 = vpop.f32.mrb[12].mxu0 }
0x146f   :  { %4460 = vtanh.f32 %v1559_v20  ;;  %v1561_v21 = vpop.f32.mrb[13].mxu0  ;;  %v3070_v23 = vmul.f32 -1.442695, %v1559_v20 }
0x1471   :  { %4462 = vpow2.f32 %v3070_v23 }
0x1479   :  { %v4461_v22 = vpop.eup %4460 }
0x147a   :  { %1572 = vrot.lane.b32.xlu1 %v4461_v22, %s4557_s29 }
0x147b   :  { %v4463_v26 = vpop.eup %4462 }
0x147c   :  { %v1566_v28 = vadd.f32 1.0, %v4463_v26  ;;  %v3074_v26 = vld [vmem:[%s5314_s1 + $0x10] sm:$0xf] }
0x147e   :  { %4464 = vrcp.f32 %v1566_v28 }
0x1488   :  { %v4465_v29 = vpop.eup %4464 }
0x1489   :  { %v1570_v63 = vmul.f32 %v4465_v29, %v4910_v2 }
0x14ec   :  { %v1573_v32 = vpop.permute.xlu1 %1572 }
0x14ed   :  { %v1575_v34 = vmul.f32 %v4465_v29, %v1573_v32 }
0x14ef   :  { %1577 = vrot.lane.b32.xlu0 %v1575_v34, %s4558_s30 }
0x1561   :  { %v1578_v35 = vpop.permute.xlu0 %1577 }
0x1562   :  { %v4996_v37 = vadd.f32 %v1578_v35, %v1570_v63 }
0x1564   :  { %4466 = vtanh.f32 %v4996_v37 }
0x156e   :  { %v4467_v39 = vpop.eup %4466 }
0x156f   :  { %1583 = vrot.lane.b32.xlu1 %v4467_v39, %s4557_s29 }
0x15e1   :  { %v1584_v55 = vpop.permute.xlu1 %1583 }
0x15e2   :  { %v1586_v42 = vmul.f32 %v4465_v29, %v1584_v55  ;;  %v1842_v29 = vsel %vm397_vm3, %v3074_v26, 1.0 }
0x15e4   :  { %1839 = vrot.lane.b32.xlu1 %v1586_v42, %s4559_s4  ;;  %1588 = vrot.lane.b32.xlu0 %v1586_v42, %s4558_s30 }
0x1656   :  { %v1589_v43 = vpop.permute.xlu0 %1588  ;;  %v1840_v32 = vpop.permute.xlu1 %1839 }
0x1657   :  { %v1591_v45 = vsel %vm528_vm7, %v1589_v43, %v4996_v37  ;;  %v1843_v63 = vsel %vm399_vm5, %v1842_v29, %v1840_v32 }
0x1658   :  { %3631 = vmatmul.mubr.msk.f32.vlgmr.msra.gmra.mrb[20].mxu1 %vm129_vm8, %v1591_v45 }
0x1659   :  { %4152 = vmatpush3.bf16.msra.mxu1 %v4632_v41  ;;  %3665 = vmatprep.mubr.msk.f32.mxu1 %vm4555_vm0, %v4556_v1 }
0x165a   :  { %4153 = vmatprep.subr.bf16.mxu1 %v4554_v0 }
0x165d   :  { %4155 = vmatpush3.bf16.msra.mxu1 %v4636_v44 }
0x165e   :  { %4156 = vmatprep.subr.bf16.mxu1 %v4554_v0 }
0x1661   :  { %4158 = vmatpush3.bf16.msra.mxu1 %v4640_v47 }
0x1662   :  { %4159 = vmatprep.subr.bf16.mxu1 %v4554_v0 }
0x1665   :  { %4161 = vmatpush3.bf16.msra.mxu1 %v4644_v50 }
0x1666   :  { %4162 = vmatprep.subr.bf16.mxu1 %v4554_v0 }
0x1669   :  { %4164 = vmatpush3.bf16.msra.mxu1 %v4648_v53 }
0x166a   :  { %4165 = vmatprep.subr.bf16.mxu1 %v4554_v0 }
0x166d   :  { %4167 = vmatpush3.bf16.msra.mxu1 %v4652_v56 }
0x166e   :  { %4168 = vmatprep.subr.bf16.mxu1 %v4554_v0 }
0x1671   :  { %4170 = vmatpush3.bf16.msra.mxu1 %v4655_v59 }
0x1672   :  { %4171 = vmatprep.subr.bf16.mxu1 %v4554_v0 }
0x1675   :  { %4173 = vmatpush3.bf16.msra.mxu1 %v4659_v62 }
0x1676   :  { %4204 = vmatprep.subr.bf16.mxu1 %v4554_v0 }
0x172b   :  { %v1661_v2 = vpop.f32.mrb[20].mxu1 }
0x172c   :  { %v1665_v38 = vmul.f32 %v5023_v46, %v1661_v2  ;;  %v3632_v48 = vpop.f32.mrb[21].mxu1 }
0x172e   :  { %v1666_v49 = vsel %vm204_vm1, %v1665_v38, 0.0 }
0x172f   :  { %v1667_v51 = vrot.slane %v1666_v49, 4 }
0x1731   :  { %v1668_v52 = vadd.f32 %v1667_v51, %v1666_v49 }
0x1733   :  { %v1669_v54 = vrot.slane %v1668_v52, 2 }
0x1735   :  { %v1670_v57 = vadd.f32 %v1669_v54, %v1668_v52 }
0x1737   :  { %v1671_v58 = vrot.slane %v1670_v57, 1 }
0x1739   :  { %v1672_v60 = vadd.f32 %v1671_v58, %v1670_v57 }
0x173b   :  { %v1673_v4 = vadd.f32 %v1672_v60, %v4668_v16 }
0x173d   :  { %4468 = vtanh.f32 %v1673_v4 }
0x1747   :  { %v4469_v5 = vpop.eup %4468 }
0x1748   :  { %3666 = vmatmul.mubr.f32.vlgmr.msra.gmra.mrb[22].mxu1 %v4469_v5 }
0x1749   :  { %4206 = vmatpush3.bf16.msra.mxu1 %v4599_v9  ;;  %3689 = vmatprep.mubr.msk.f32.mxu1 %vm4555_vm0, %v4556_v1 }
0x174a   :  { %4207 = vmatprep.subr.bf16.mxu1 %v4554_v0 }
0x174d   :  { %4209 = vmatpush3.bf16.msra.mxu1 %v4603_v13 }
0x174e   :  { %4210 = vmatprep.subr.bf16.mxu1 %v4554_v0 }
0x1751   :  { %4212 = vmatpush3.bf16.msra.mxu1 %v4608_v19 }
0x1752   :  { %4213 = vmatprep.subr.bf16.mxu1 %v4554_v0 }
0x1755   :  { %4215 = vmatpush3.bf16.msra.mxu1 %v4613_v25 }
0x1756   :  { %4216 = vmatprep.subr.bf16.mxu1 %v4554_v0 }
0x181b   :  { %v1741_v7 = vpop.f32.mrb[22].mxu1 }
0x181c   :  { %v1745_v8 = vmul.f32 1.442695, %v1741_v7  ;;  %v3667_v11 = vpop.f32.mrb[23].mxu1 }
0x181e   :  { %4470 = vpow2.f32 %v1745_v8 }
0x1828   :  { %v4471_v31 = vpop.eup %4470 }
0x1829   :  { %v1747_v12 = vsel %vm302_vm2, %v4471_v31, 0.0 }
0x182a   :  { %v1748_v15 = vrot.slane %v1747_v12, 4 }
0x182c   :  { %v1749_v18 = vadd.f32 %v1748_v15, %v1747_v12 }
0x182e   :  { %v1750_v20 = vrot.slane %v1749_v18, 2 }
0x1830   :  { %v1751_v21 = vadd.f32 %v1750_v20, %v1749_v18 }
0x1832   :  { %v1752_v22 = vrot.slane %v1751_v21, 1 }
0x1834   :  { %v1753_v23 = vadd.f32 %v1752_v22, %v1751_v21 }
0x1836   :  { %4472 = vrcp.f32 %v1753_v23 }
0x1840   :  { %v4473_v28 = vpop.eup %4472 }
0x1841   :  { %v1755_v34 = vmul.f32 %v4473_v28, %v4471_v31 }
0x1843   :  { %3671 = vmatmul.mubr.msk.f32.vlgmr.msra.gmra.mrb[14].mxu0 %vm302_vm2, %v1755_v34 }
0x1844   :  { %3076 = vmatprep.mubr.msk.f32.mxu0 %vm422_vm6, %v1843_v63  ;;  %4176 = vmatpush1.bf16.msra.mxu0 %v4676_v24 }
0x1845   :  { %4177 = vmatprep.subr.bf16.mxu0 %v4554_v0 }
0x1848   :  { %4179 = vmatpush1.bf16.msra.mxu0 %v4679_v27 }
0x1849   :  { %4180 = vmatprep.subr.bf16.mxu0 %v4554_v0 }
0x184c   :  { %4182 = vmatpush1.bf16.msra.mxu0 %v4683_v30 }
0x184d   :  { %4183 = vmatprep.subr.bf16.mxu0 %v4554_v0 }
0x1850   :  { %4185 = vmatpush1.bf16.msra.mxu0 %v4687_v33 }
0x1851   :  { %4186 = vmatprep.subr.bf16.mxu0 %v4554_v0 }
0x1854   :  { %4188 = vmatpush1.bf16.msra.mxu0 %v4691_v36 }
0x1855   :  { %4189 = vmatprep.subr.bf16.mxu0 %v4554_v0 }
0x1858   :  { %4191 = vmatpush1.bf16.msra.mxu0 %v4695_v40 }
0x1859   :  { %4192 = vmatprep.subr.bf16.mxu0 %v4554_v0 }
0x185c   :  { %4194 = vmatpush1.bf16.msra.mxu0 %v4712_v3 }
0x185d   :  { %4195 = vmatprep.subr.bf16.mxu0 %v4554_v0 }
0x1860   :  { %4197 = vmatpush1.bf16.msra.mxu0 %v4716_v6 }
0x1861   :  { %4198 = vmatprep.subr.bf16.mxu0 %v4554_v0 }
0x1864   :  { %4200 = vmatpush1.bf16.msra.mxu0 %v4720_v10 }
0x1865   :  { %4201 = vmatprep.subr.bf16.mxu0 %v4554_v0 }
0x1868   :  { %4203 = vmatpush1.bf16.msra.mxu0 %v4724_v14 }
0x1869   :  { %1887 = vmatprep.subr.mxu0 %v4556_v1 }
0x186c   :  { %3075 = vmatpush1.msk.msra.mxu0 %vm426_vm4, %v4731_v17 }
0x186d   :  { %3727 = vmatprep.subr.mxu0 %v4556_v1 }
0x1916   :  { %v1825_v35 = vpop.f32.mrb[14].mxu0 }
0x1917   :  { %v1829_v39 = vmul.f32 %v4984_v61, %v1825_v35  ;;  %v3672_v55 = vpop.f32.mrb[15].mxu0 }
0x1919   :  { %v1830_v42 = vrot.slane %v1829_v39, 4 }
0x191b   :  { %v1831_v43 = vadd.f32 %v1830_v42, %v1829_v39 }
0x191d   :  { %v1832_v45 = vrot.slane %v1831_v43, 2 }
0x191f   :  { %v1833_v2 = vadd.f32 %v1832_v45, %v1831_v43 }
0x1921   :  { %v1834_v38 = vrot.slane %v1833_v2, 1 }
0x1923   :  { %v1835_v48 = vadd.f32 %v1834_v38, %v1833_v2 }
0x1925   :  { %v1836_v49 = vmul.f32 %v5023_v46, %v1835_v48 }
0x1927   :  { %1912 = vmatmul.mubr.f32.vlgmr.msra.gmra.mrb[16].mxu0 %v1836_v49 }
0x1928   :  { %3728 = vmatpush3.msk.msra.mxu0 %vm204_vm1, %v5023_v46  ;;  %3729 = vmatprep.mubr.msk.f32.mxu0 %vm4555_vm0, %v4556_v1 }
0x1929   :  { %4240 = vmatprep.subr.bf16.mxu0 %v4554_v0 }
0x19fa   :  { %v1913_v17 = vpop.f32.mrb[16].mxu0 }
0x19fb   :  { %4474 = vtanh.f32 %v1913_v17  ;;  %v1915_v51 = vpop.f32.mrb[17].mxu0  ;;  %v3077_v54 = vmul.f32 -1.442695, %v1913_v17 }
0x19fd   :  { %4476 = vpow2.f32 %v3077_v54  ;;  %v3081_v54 = vld [vmem:[%s5314_s1 + $0x14] sm:$0xf] }
0x1a05   :  { %v4475_v52 = vpop.eup %4474 }
0x1a06   :  { %1926 = vrot.lane.b32.xlu0 %v4475_v52, %s4557_s29 }
0x1a07   :  { %v4477_v57 = vpop.eup %4476 }
0x1a08   :  { %v1920_v58 = vadd.f32 1.0, %v4477_v57 }
0x1a0a   :  { %4478 = vrcp.f32 %v1920_v58  ;;  %v2196_v58 = vsel %vm397_vm3, %v3081_v54, 1.0 }
0x1a14   :  { %v4479_v60 = vpop.eup %4478 }
0x1a15   :  { %v1924_v7 = vmul.f32 %v4479_v60, %v4996_v37 }
0x1a78   :  { %v1927_v4 = vpop.permute.xlu0 %1926 }
0x1a79   :  { %v1929_v5 = vmul.f32 %v4479_v60, %v1927_v4 }
0x1a7b   :  { %1931 = vrot.lane.b32.xlu1 %v1929_v5, %s4558_s30 }
0x1aed   :  { %v1932_v8 = vpop.permute.xlu1 %1931 }
0x1aee   :  { %v5079_v11 = vadd.f32 %v1932_v8, %v1924_v7  ;;  %v5147_v7 = vld [vmem:[#allocation2 + $0x1f0] sm:$0x3] }
0x1af0   :  { %4480 = vtanh.f32 %v5079_v11 }
0x1afa   :  { %v4481_v31 = vpop.eup %4480 }
0x1afb   :  { %1937 = vrot.lane.b32.xlu0 %v4481_v31, %s4557_s29 }
0x1b6d   :  { %v1938_v12 = vpop.permute.xlu0 %1937 }
0x1b6e   :  { %v1940_v15 = vmul.f32 %v4479_v60, %v1938_v12 }
0x1b70   :  { %2193 = vrot.lane.b32.xlu0 %v1940_v15, %s4559_s4  ;;  %1942 = vrot.lane.b32.xlu1 %v1940_v15, %s4558_s30 }
0x1be2   :  { %v1943_v18 = vpop.permute.xlu1 %1942  ;;  %v2194_v60 = vpop.permute.xlu0 %2193 }
0x1be3   :  { %v1945_v20 = vsel %vm528_vm7, %v1943_v18, %v5079_v11  ;;  %v2197_v5 = vsel %vm399_vm5, %v2196_v58, %v2194_v60 }
0x1be4   :  { %3690 = vmatmul.mubr.msk.f32.vlgmr.msra.gmra.mrb[24].mxu1 %vm129_vm8, %v1945_v20 }
0x1be5   :  { %4218 = vmatpush3.bf16.msra.mxu1 %v4632_v41  ;;  %3724 = vmatprep.mubr.msk.f32.mxu1 %vm4555_vm0, %v4556_v1 }
0x1be6   :  { %4219 = vmatprep.subr.bf16.mxu1 %v4554_v0 }
0x1be9   :  { %4221 = vmatpush3.bf16.msra.mxu1 %v4636_v44 }
0x1bea   :  { %4222 = vmatprep.subr.bf16.mxu1 %v4554_v0 }
0x1bed   :  { %4224 = vmatpush3.bf16.msra.mxu1 %v4640_v47 }
0x1bee   :  { %4225 = vmatprep.subr.bf16.mxu1 %v4554_v0 }
0x1bf1   :  { %4227 = vmatpush3.bf16.msra.mxu1 %v4644_v50 }
0x1bf2   :  { %4228 = vmatprep.subr.bf16.mxu1 %v4554_v0 }
0x1bf5   :  { %4230 = vmatpush3.bf16.msra.mxu1 %v4648_v53 }
0x1bf6   :  { %4231 = vmatprep.subr.bf16.mxu1 %v4554_v0 }
0x1bf9   :  { %4233 = vmatpush3.bf16.msra.mxu1 %v4652_v56 }
0x1bfa   :  { %4234 = vmatprep.subr.bf16.mxu1 %v4554_v0 }
0x1bfd   :  { %4236 = vmatpush3.bf16.msra.mxu1 %v4655_v59 }
0x1bfe   :  { %4237 = vmatprep.subr.bf16.mxu1 %v4554_v0 }
0x1c01   :  { %4239 = vmatpush3.bf16.msra.mxu1 %v4659_v62 }
0x1c02   :  { %4270 = vmatprep.subr.bf16.mxu1 %v4554_v0 }
0x1cb7   :  { %v2015_v37 = vpop.f32.mrb[24].mxu1 }
0x1cb8   :  { %v2019_v21 = vmul.f32 %v5023_v46, %v2015_v37  ;;  %v3691_v22 = vpop.f32.mrb[25].mxu1 }
0x1cba   :  { %v2020_v23 = vsel %vm204_vm1, %v2019_v21, 0.0 }
0x1cbb   :  { %v2021_v26 = vrot.slane %v2020_v23, 4 }
0x1cbd   :  { %v2022_v28 = vadd.f32 %v2021_v26, %v2020_v23 }
0x1cbf   :  { %v2023_v29 = vrot.slane %v2022_v28, 2 }
0x1cc1   :  { %v2024_v32 = vadd.f32 %v2023_v29, %v2022_v28 }
0x1cc3   :  { %v2025_v34 = vrot.slane %v2024_v32, 1 }
0x1cc5   :  { %v2026_v63 = vadd.f32 %v2025_v34, %v2024_v32 }
0x1cc7   :  { %v2027_v35 = vadd.f32 %v2026_v63, %v4668_v16 }
0x1cc9   :  { %4482 = vtanh.f32 %v2027_v35 }
0x1cd3   :  { %v4483_v39 = vpop.eup %4482 }
0x1cd4   :  { %3725 = vmatmul.mubr.f32.vlgmr.msra.gmra.mrb[26].mxu1 %v4483_v39 }
0x1cd5   :  { %4272 = vmatpush3.bf16.msra.mxu1 %v4599_v9  ;;  %3748 = vmatprep.mubr.msk.f32.mxu1 %vm4555_vm0, %v4556_v1 }
0x1cd6   :  { %4273 = vmatprep.subr.bf16.mxu1 %v4554_v0 }
0x1cd9   :  { %4275 = vmatpush3.bf16.msra.mxu1 %v4603_v13 }
0x1cda   :  { %4276 = vmatprep.subr.bf16.mxu1 %v4554_v0 }
0x1cdd   :  { %4278 = vmatpush3.bf16.msra.mxu1 %v4608_v19 }
0x1cde   :  { %4279 = vmatprep.subr.bf16.mxu1 %v4554_v0 }
0x1ce1   :  { %4281 = vmatpush3.bf16.msra.mxu1 %v4613_v25 }
0x1ce2   :  { %4282 = vmatprep.subr.bf16.mxu1 %v4554_v0 }
0x1da7   :  { %v2095_v55 = vpop.f32.mrb[26].mxu1 }
0x1da8   :  { %v2099_v42 = vmul.f32 1.442695, %v2095_v55  ;;  %v3726_v43 = vpop.f32.mrb[27].mxu1 }
0x1daa   :  { %4484 = vpow2.f32 %v2099_v42 }
0x1db4   :  { %v4485_v45 = vpop.eup %4484 }
0x1db5   :  { %v2101_v2 = vsel %vm302_vm2, %v4485_v45, 0.0 }
0x1db6   :  { %v2102_v38 = vrot.slane %v2101_v2, 4 }
0x1db8   :  { %v2103_v48 = vadd.f32 %v2102_v38, %v2101_v2 }
0x1dba   :  { %v2104_v49 = vrot.slane %v2103_v48, 2 }
0x1dbc   :  { %v2105_v17 = vadd.f32 %v2104_v49, %v2103_v48 }
0x1dbe   :  { %v2106_v51 = vrot.slane %v2105_v17, 1 }
0x1dc0   :  { %v2107_v52 = vadd.f32 %v2106_v51, %v2105_v17 }
0x1dc2   :  { %4486 = vrcp.f32 %v2107_v52 }
0x1dcc   :  { %v4487_v57 = vpop.eup %4486 }
0x1dcd   :  { %v2109_v4 = vmul.f32 %v4487_v57, %v4485_v45 }
0x1dcf   :  { %3730 = vmatmul.mubr.msk.f32.vlgmr.msra.gmra.mrb[18].mxu0 %vm302_vm2, %v2109_v4 }
0x1dd0   :  { %3083 = vmatprep.mubr.msk.f32.mxu0 %vm422_vm6, %v2197_v5  ;;  %4242 = vmatpush1.bf16.msra.mxu0 %v4676_v24 }
0x1dd1   :  { %4243 = vmatprep.subr.bf16.mxu0 %v4554_v0 }
0x1dd4   :  { %4245 = vmatpush1.bf16.msra.mxu0 %v4679_v27 }
0x1dd5   :  { %4246 = vmatprep.subr.bf16.mxu0 %v4554_v0 }
0x1dd8   :  { %4248 = vmatpush1.bf16.msra.mxu0 %v4683_v30 }
0x1dd9   :  { %4249 = vmatprep.subr.bf16.mxu0 %v4554_v0 }
0x1ddc   :  { %4251 = vmatpush1.bf16.msra.mxu0 %v4687_v33 }
0x1ddd   :  { %4252 = vmatprep.subr.bf16.mxu0 %v4554_v0 }
0x1de0   :  { %4254 = vmatpush1.bf16.msra.mxu0 %v4691_v36 }
0x1de1   :  { %4255 = vmatprep.subr.bf16.mxu0 %v4554_v0 }
0x1de4   :  { %4257 = vmatpush1.bf16.msra.mxu0 %v4695_v40 }
0x1de5   :  { %4258 = vmatprep.subr.bf16.mxu0 %v4554_v0 }
0x1de8   :  { %4260 = vmatpush1.bf16.msra.mxu0 %v4712_v3 }
0x1de9   :  { %4261 = vmatprep.subr.bf16.mxu0 %v4554_v0 }
0x1dec   :  { %4263 = vmatpush1.bf16.msra.mxu0 %v4716_v6 }
0x1ded   :  { %4264 = vmatprep.subr.bf16.mxu0 %v4554_v0 }
0x1df0   :  { %4266 = vmatpush1.bf16.msra.mxu0 %v4720_v10 }
0x1df1   :  { %4267 = vmatprep.subr.bf16.mxu0 %v4554_v0 }
0x1df4   :  { %4269 = vmatpush1.bf16.msra.mxu0 %v4724_v14 }
0x1df5   :  { %2241 = vmatprep.subr.mxu0 %v4556_v1 }
0x1df8   :  { %3082 = vmatpush1.msk.msra.mxu0 %vm426_vm4, %v5147_v7 }
0x1df9   :  { %3786 = vmatprep.subr.mxu0 %v4556_v1 }
0x1ea2   :  { %v2179_v8 = vpop.f32.mrb[18].mxu0 }
0x1ea3   :  { %v2183_v31 = vmul.f32 %v4984_v61, %v2179_v8  ;;  %v3731_v12 = vpop.f32.mrb[19].mxu0 }
0x1ea5   :  { %v2184_v15 = vrot.slane %v2183_v31, 4 }
0x1ea7   :  { %v2185_v18 = vadd.f32 %v2184_v15, %v2183_v31 }
0x1ea9   :  { %v2186_v20 = vrot.slane %v2185_v18, 2 }
0x1eab   :  { %v2187_v37 = vadd.f32 %v2186_v20, %v2185_v18 }
0x1ead   :  { %v2188_v21 = vrot.slane %v2187_v37, 1 }
0x1eaf   :  { %v2189_v22 = vadd.f32 %v2188_v21, %v2187_v37 }
0x1eb1   :  { %v2190_v23 = vmul.f32 %v5023_v46, %v2189_v22 }
0x1eb3   :  { %2266 = vmatmul.mubr.f32.vlgmr.msra.gmra.mrb[20].mxu0 %v2190_v23 }
0x1eb4   :  { %3787 = vmatpush3.msk.msra.mxu0 %vm204_vm1, %v5023_v46  ;;  %3788 = vmatprep.mubr.msk.f32.mxu0 %vm4555_vm0, %v4556_v1 }
0x1eb5   :  { %4306 = vmatprep.subr.bf16.mxu0 %v4554_v0 }
0x1f86   :  { %v2267_v26 = vpop.f32.mrb[20].mxu0 }
0x1f87   :  { %4488 = vtanh.f32 %v2267_v26  ;;  %v2269_v28 = vpop.f32.mrb[21].mxu0  ;;  %v3084_v32 = vmul.f32 -1.442695, %v2267_v26 }
0x1f89   :  { %4490 = vpow2.f32 %v3084_v32 }
0x1f91   :  { %v4489_v29 = vpop.eup %4488 }
0x1f92   :  { %2280 = vrot.lane.b32.xlu1 %v4489_v29, %s4557_s29 }
0x1f93   :  { %v4491_v34 = vpop.eup %4490 }
0x1f94   :  { %v2274_v63 = vadd.f32 1.0, %v4491_v34 }
0x1f96   :  { %4492 = vrcp.f32 %v2274_v63 }
0x1fa0   :  { %v4493_v35 = vpop.eup %4492 }
0x1fa1   :  { %v2278_v42 = vmul.f32 %v4493_v35, %v5079_v11 }
0x2004   :  { %v2281_v39 = vpop.permute.xlu1 %2280 }
0x2005   :  { %v2283_v55 = vmul.f32 %v4493_v35, %v2281_v39 }
0x2007   :  { %2285 = vrot.lane.b32.xlu0 %v2283_v55, %s4558_s30 }
0x2079   :  { %v2286_v43 = vpop.permute.xlu0 %2285 }
0x207a   :  { %v5162_v45 = vadd.f32 %v2286_v43, %v2278_v42 }
0x207c   :  { %4494 = vtanh.f32 %v5162_v45 }
0x2086   :  { %v4495_v2 = vpop.eup %4494 }
0x2087   :  { %2291 = vrot.lane.b32.xlu1 %v4495_v2, %s4557_s29 }
0x20f9   :  { %v2292_v38 = vpop.permute.xlu1 %2291 }
0x20fa   :  { %v2294_v48 = vmul.f32 %v4493_v35, %v2292_v38 }
0x20fc   :  { %2547 = vrot.lane.b32.xlu1 %v2294_v48, %s4559_s4  ;;  %2296 = vrot.lane.b32.xlu0 %v2294_v48, %s4558_s30 }
0x216e   :  { %v2297_v49 = vpop.permute.xlu0 %2296  ;;  %v2548_v32 = vpop.permute.xlu1 %2547 }
0x216f   :  { %v2299_v17 = vsel %vm528_vm7, %v2297_v49, %v5162_v45 }
0x2170   :  { %3749 = vmatmul.mubr.msk.f32.vlgmr.msra.gmra.mrb[28].mxu1 %vm129_vm8, %v2299_v17 }
0x2171   :  { %4284 = vmatpush3.bf16.msra.mxu1 %v4632_v41  ;;  %3783 = vmatprep.mubr.msk.f32.mxu1 %vm4555_vm0, %v4556_v1 }
0x2172   :  { %4285 = vmatprep.subr.bf16.mxu1 %v4554_v0 }
0x2175   :  { %4287 = vmatpush3.bf16.msra.mxu1 %v4636_v44 }
0x2176   :  { %4288 = vmatprep.subr.bf16.mxu1 %v4554_v0 }
0x2179   :  { %4290 = vmatpush3.bf16.msra.mxu1 %v4640_v47 }
0x217a   :  { %4291 = vmatprep.subr.bf16.mxu1 %v4554_v0 }
0x217d   :  { %4293 = vmatpush3.bf16.msra.mxu1 %v4644_v50 }
0x217e   :  { %4294 = vmatprep.subr.bf16.mxu1 %v4554_v0 }
0x2181   :  { %4296 = vmatpush3.bf16.msra.mxu1 %v4648_v53 }
0x2182   :  { %4297 = vmatprep.subr.bf16.mxu1 %v4554_v0 }
0x2185   :  { %4299 = vmatpush3.bf16.msra.mxu1 %v4652_v56 }
0x2186   :  { %4300 = vmatprep.subr.bf16.mxu1 %v4554_v0 }
0x2189   :  { %4302 = vmatpush3.bf16.msra.mxu1 %v4655_v59 }
0x218a   :  { %4303 = vmatprep.subr.bf16.mxu1 %v4554_v0 }
0x218d   :  { %4305 = vmatpush3.bf16.msra.mxu1 %v4659_v62 }
0x218e   :  { %4336 = vmatprep.subr.bf16.mxu1 %v4554_v0 }
0x2243   :  { %v2369_v11 = vpop.f32.mrb[28].mxu1 }
0x2244   :  { %v2373_v51 = vmul.f32 %v5023_v46, %v2369_v11  ;;  %v3750_v52 = vpop.f32.mrb[29].mxu1 }
0x2246   :  { %v2374_v54 = vsel %vm204_vm1, %v2373_v51, 0.0 }
0x2247   :  { %v2375_v57 = vrot.slane %v2374_v54, 4 }
0x2249   :  { %v2376_v58 = vadd.f32 %v2375_v57, %v2374_v54 }
0x224b   :  { %v2377_v60 = vrot.slane %v2376_v58, 2 }
0x224d   :  { %v2378_v4 = vadd.f32 %v2377_v60, %v2376_v58 }
0x224f   :  { %v2379_v5 = vrot.slane %v2378_v4, 1 }
0x2251   :  { %v2380_v8 = vadd.f32 %v2379_v5, %v2378_v4 }
0x2253   :  { %v2381_v31 = vadd.f32 %v2380_v8, %v4668_v16 }
0x2255   :  { %4496 = vtanh.f32 %v2381_v31 }
0x225f   :  { %v4497_v12 = vpop.eup %4496 }
0x2260   :  { %3784 = vmatmul.mubr.f32.vlgmr.msra.gmra.mrb[30].mxu1 %v4497_v12 }
0x2261   :  { %4338 = vmatpush3.bf16.msra.mxu1 %v4599_v9  ;;  %3807 = vmatprep.mubr.msk.f32.mxu1 %vm4555_vm0, %v4556_v1 }
0x2262   :  { %4339 = vmatprep.subr.bf16.mxu1 %v4554_v0 }
0x2265   :  { %4341 = vmatpush3.bf16.msra.mxu1 %v4603_v13 }
0x2266   :  { %4342 = vmatprep.subr.bf16.mxu1 %v4554_v0 }
0x2269   :  { %4344 = vmatpush3.bf16.msra.mxu1 %v4608_v19  ;;  %v3088_v19 = vld [vmem:[%s5314_s1 + $0x18] sm:$0xf] }
0x226a   :  { %4345 = vmatprep.subr.bf16.mxu1 %v4554_v0  ;;  %v2550_v29 = vsel %vm397_vm3, %v3088_v19, 1.0 }
0x226b   :  { %v2551_v63 = vsel %vm399_vm5, %v2550_v29, %v2548_v32 }
0x226d   :  { %4347 = vmatpush3.bf16.msra.mxu1 %v4613_v25 }
0x226e   :  { %4348 = vmatprep.subr.bf16.mxu1 %v4554_v0 }
0x2333   :  { %v2449_v15 = vpop.f32.mrb[30].mxu1 }
0x2334   :  { %v2453_v18 = vmul.f32 1.442695, %v2449_v15  ;;  %v3785_v9 = vpop.f32.mrb[31].mxu1 }
0x2336   :  { %4498 = vpow2.f32 %v2453_v18 }
0x2340   :  { %v4499_v20 = vpop.eup %4498 }
0x2341   :  { %v2455_v37 = vsel %vm302_vm2, %v4499_v20, 0.0 }
0x2342   :  { %v2456_v21 = vrot.slane %v2455_v37, 4 }
0x2344   :  { %v2457_v22 = vadd.f32 %v2456_v21, %v2455_v37 }
0x2346   :  { %v2458_v13 = vrot.slane %v2457_v22, 2 }
0x2348   :  { %v2459_v23 = vadd.f32 %v2458_v13, %v2457_v22 }
0x234a   :  { %v2460_v26 = vrot.slane %v2459_v23, 1 }
0x234c   :  { %v2461_v28 = vadd.f32 %v2460_v26, %v2459_v23 }
0x234e   :  { %4500 = vrcp.f32 %v2461_v28 }
0x2358   :  { %v4501_v25 = vpop.eup %4500 }
0x2359   :  { %v2463_v34 = vmul.f32 %v4501_v25, %v4499_v20 }
0x235b   :  { %3789 = vmatmul.mubr.msk.f32.vlgmr.msra.gmra.mrb[22].mxu0 %vm302_vm2, %v2463_v34 }
0x235c   :  { %3090 = vmatprep.mubr.msk.f32.mxu0 %vm422_vm6, %v2551_v63  ;;  %4308 = vmatpush1.bf16.msra.mxu0 %v4676_v24 }
0x235d   :  { %4309 = vmatprep.subr.bf16.mxu0 %v4554_v0 }
0x2360   :  { %4311 = vmatpush1.bf16.msra.mxu0 %v4679_v27 }
0x2361   :  { %4312 = vmatprep.subr.bf16.mxu0 %v4554_v0 }
0x2364   :  { %4314 = vmatpush1.bf16.msra.mxu0 %v4683_v30 }
0x2365   :  { %4315 = vmatprep.subr.bf16.mxu0 %v4554_v0 }
0x2368   :  { %4317 = vmatpush1.bf16.msra.mxu0 %v4687_v33 }
0x2369   :  { %4318 = vmatprep.subr.bf16.mxu0 %v4554_v0 }
0x236c   :  { %4320 = vmatpush1.bf16.msra.mxu0 %v4691_v36 }
0x236d   :  { %4321 = vmatprep.subr.bf16.mxu0 %v4554_v0 }
0x2370   :  { %4323 = vmatpush1.bf16.msra.mxu0 %v4695_v40 }
0x2371   :  { %4324 = vmatprep.subr.bf16.mxu0 %v4554_v0 }
0x2374   :  { %4326 = vmatpush1.bf16.msra.mxu0 %v4712_v3 }
0x2375   :  { %4327 = vmatprep.subr.bf16.mxu0 %v4554_v0 }
0x2378   :  { %4329 = vmatpush1.bf16.msra.mxu0 %v4716_v6 }
0x2379   :  { %4330 = vmatprep.subr.bf16.mxu0 %v4554_v0 }
0x237c   :  { %4332 = vmatpush1.bf16.msra.mxu0 %v4720_v10 }
0x237d   :  { %4333 = vmatprep.subr.bf16.mxu0 %v4554_v0 }
0x2380   :  { %4335 = vmatpush1.bf16.msra.mxu0 %v4724_v14 }
0x2381   :  { %2595 = vmatprep.subr.mxu0 %v4556_v1 }
0x2384   :  { %3089 = vmatpush1.msk.msra.mxu0 %vm426_vm4, %v5147_v7 }
0x2385   :  { %3845 = vmatprep.subr.mxu0 %v4556_v1 }
0x242e   :  { %v2533_v35 = vpop.f32.mrb[22].mxu0 }
0x242f   :  { %v2537_v39 = vmul.f32 %v4984_v61, %v2533_v35  ;;  %v3790_v55 = vpop.f32.mrb[23].mxu0 }
0x2431   :  { %v2538_v42 = vrot.slane %v2537_v39, 4 }
0x2433   :  { %v2539_v43 = vadd.f32 %v2538_v42, %v2537_v39 }
0x2435   :  { %v2540_v2 = vrot.slane %v2539_v43, 2 }
0x2437   :  { %v2541_v38 = vadd.f32 %v2540_v2, %v2539_v43 }
0x2439   :  { %v2542_v48 = vrot.slane %v2541_v38, 1 }
0x243b   :  { %v2543_v49 = vadd.f32 %v2542_v48, %v2541_v38 }
0x243d   :  { %v2544_v17 = vmul.f32 %v5023_v46, %v2543_v49 }
0x243f   :  { %2620 = vmatmul.mubr.f32.vlgmr.msra.gmra.mrb[24].mxu0 %v2544_v17 }
0x2440   :  { %3846 = vmatpush3.msk.msra.mxu0 %vm204_vm1, %v5023_v46  ;;  %3847 = vmatprep.mubr.msk.f32.mxu0 %vm4555_vm0, %v4556_v1 }
0x2441   :  { %4372 = vmatprep.subr.bf16.mxu0 %v4554_v0 }
0x2512   :  { %v2621_v11 = vpop.f32.mrb[24].mxu0 }
0x2513   :  { %4502 = vtanh.f32 %v2621_v11  ;;  %v2623_v51 = vpop.f32.mrb[25].mxu0  ;;  %v3091_v54 = vmul.f32 -1.442695, %v2621_v11 }
0x2515   :  { %4504 = vpow2.f32 %v3091_v54 }
0x251d   :  { %v4503_v52 = vpop.eup %4502 }
0x251e   :  { %2634 = vrot.lane.b32.xlu0 %v4503_v52, %s4557_s29  ;;  %v3099_v52 = vld [vmem:[#allocation2 + $0x1f8] ss:$0 sm:$0xff] }
0x251f   :  { %v4505_v57 = vpop.eup %4504 }
0x2520   :  { %v2628_v58 = vadd.f32 1.0, %v4505_v57 }
0x2522   :  { %4506 = vrcp.f32 %v2628_v58 }
0x252c   :  { %v4507_v60 = vpop.eup %4506 }
0x252d   :  { %v2632_v8 = vmul.f32 %v4507_v60, %v5162_v45 }
0x2590   :  { %v2635_v4 = vpop.permute.xlu0 %2634 }
0x2591   :  { %v2637_v5 = vmul.f32 %v4507_v60, %v2635_v4 }
0x2593   :  { %2639 = vrot.lane.b32.xlu1 %v2637_v5, %s4558_s30 }
0x2605   :  { %v2640_v31 = vpop.permute.xlu1 %2639 }
0x2606   :  { %v5243_v12 = vadd.f32 %v2640_v31, %v2632_v8  ;;  %v3100_v31 = vld [vmem:[#allocation2 + $0x200] ss:$0 sm:$0xff] }
0x2608   :  { %4508 = vtanh.f32 %v5243_v12 }
0x2612   :  { %v4509_v15 = vpop.eup %4508 }
0x2613   :  { %2645 = vrot.lane.b32.xlu0 %v4509_v15, %s4557_s29 }
0x2685   :  { %v2646_v18 = vpop.permute.xlu0 %2645 }
0x2686   :  { %v2648_v9 = vmul.f32 %v4507_v60, %v2646_v18 }
0x2688   :  { %2901 = vrot.lane.b32.xlu0 %v2648_v9, %s4559_s4  ;;  %2650 = vrot.lane.b32.xlu1 %v2648_v9, %s4558_s30 }
0x26fa   :  { %v2651_v20 = vpop.permute.xlu1 %2650  ;;  %v2902_v43 = vpop.permute.xlu0 %2901 }
0x26fb   :  { %v2653_v37 = vsel %vm528_vm7, %v2651_v20, %v5243_v12 }
0x26fc   :  { %3808 = vmatmul.mubr.msk.f32.vlgmr.msra.gmra.mrb[32].mxu1 %vm129_vm8, %v2653_v37  ;;  %v3101_v37 = vld [vmem:[#allocation2 + $0x208] ss:$0 sm:$0xff] }
0x26fd   :  { %4350 = vmatpush3.bf16.msra.mxu1 %v4632_v41  ;;  %3842 = vmatprep.mubr.msk.f32.mxu1 %vm4555_vm0, %v4556_v1 }
0x26fe   :  { %4351 = vmatprep.subr.bf16.mxu1 %v4554_v0 }
0x2701   :  { %4353 = vmatpush3.bf16.msra.mxu1 %v4636_v44 }
0x2702   :  { %4354 = vmatprep.subr.bf16.mxu1 %v4554_v0 }
0x2705   :  { %4356 = vmatpush3.bf16.msra.mxu1 %v4640_v47 }
0x2706   :  { %4357 = vmatprep.subr.bf16.mxu1 %v4554_v0 }
0x2709   :  { %4359 = vmatpush3.bf16.msra.mxu1 %v4644_v50 }
0x270a   :  { %4360 = vmatprep.subr.bf16.mxu1 %v4554_v0 }
0x270d   :  { %4362 = vmatpush3.bf16.msra.mxu1 %v4648_v53 }
0x270e   :  { %4363 = vmatprep.subr.bf16.mxu1 %v4554_v0 }
0x2711   :  { %4365 = vmatpush3.bf16.msra.mxu1 %v4652_v56 }
0x2712   :  { %4366 = vmatprep.subr.bf16.mxu1 %v4554_v0 }
0x2715   :  { %4368 = vmatpush3.bf16.msra.mxu1 %v4655_v59 }
0x2716   :  { %4369 = vmatprep.subr.bf16.mxu1 %v4554_v0 }
0x2719   :  { %4371 = vmatpush3.bf16.msra.mxu1 %v4659_v62 }
0x27cf   :  { %v2723_v41 = vpop.f32.mrb[32].mxu1 }
0x27d0   :  { %v2727_v44 = vmul.f32 %v5023_v46, %v2723_v41  ;;  %v3809_v47 = vpop.f32.mrb[33].mxu1 }
0x27d2   :  { %v2728_v50 = vsel %vm204_vm1, %v2727_v44, 0.0 }
0x27d3   :  { %v2729_v45 = vrot.slane %v2728_v50, 4 }
0x27d5   :  { %v2730_v53 = vadd.f32 %v2729_v45, %v2728_v50 }
0x27d7   :  { %v2731_v21 = vrot.slane %v2730_v53, 2 }
0x27d9   :  { %v2732_v22 = vadd.f32 %v2731_v21, %v2730_v53 }
0x27db   :  { %v2733_v13 = vrot.slane %v2732_v22, 1 }
0x27dd   :  { %v2734_v56 = vadd.f32 %v2733_v13, %v2732_v22 }
0x27df   :  { %v2735_v23 = vadd.f32 %v2734_v56, %v4668_v16  ;;  %v3095_v16 = vld [vmem:[%s5314_s1 + $0x1c] sm:$0xf]  ;;  %s4560_s1 = smov 96  }
0x27e0   :  { %v2904_v42 = vsel %vm397_vm3, %v3095_v16, 1.0 }
0x27e1   :  { %4510 = vtanh.f32 %v2735_v23  ;;  %v2905_v38 = vsel %vm399_vm5, %v2904_v42, %v2902_v43 }
0x27eb   :  { %v4511_v59 = vpop.eup %4510 }
0x27ec   :  { %3843 = vmatmul.mubr.f32.vlgmr.msra.gmra.mrb[34].mxu1 %v4511_v59 }
0x28bf   :  { %v2803_v26 = vpop.f32.mrb[34].mxu1 }
0x28c0   :  { %v2807_v28 = vmul.f32 1.442695, %v2803_v26  ;;  %v3844_v62 = vpop.f32.mrb[35].mxu1 }
0x28c2   :  { %4512 = vpow2.f32 %v2807_v28 }
0x28cc   :  { %v4513_v19 = vpop.eup %4512 }
0x28cd   :  { %v2809_v25 = vsel %vm302_vm2, %v4513_v19, 0.0 }
0x28ce   :  { %v2810_v29 = vrot.slane %v2809_v25, 4 }
0x28d0   :  { %v2811_v32 = vadd.f32 %v2810_v29, %v2809_v25 }
0x28d2   :  { %v2812_v34 = vrot.slane %v2811_v32, 2 }
0x28d4   :  { %v2813_v63 = vadd.f32 %v2812_v34, %v2811_v32 }
0x28d6   :  { %v2814_v35 = vrot.slane %v2813_v63, 1 }
0x28d8   :  { %v2815_v39 = vadd.f32 %v2814_v35, %v2813_v63 }
0x28da   :  { %4514 = vrcp.f32 %v2815_v39 }
0x28e4   :  { %v4515_v55 = vpop.eup %4514 }
0x28e5   :  { %v2817_v2 = vmul.f32 %v4515_v55, %v4513_v19 }
0x28e7   :  { %3848 = vmatmul.mubr.msk.f32.vlgmr.msra.gmra.mrb[26].mxu0 %vm302_vm2, %v2817_v2 }
0x28e8   :  { %3097 = vmatprep.mubr.msk.f32.mxu0 %vm422_vm6, %v2905_v38  ;;  %4374 = vmatpush1.bf16.msra.mxu0 %v4676_v24 }
0x28e9   :  { %4375 = vmatprep.subr.bf16.mxu0 %v4554_v0 }
0x28ec   :  { %4377 = vmatpush1.bf16.msra.mxu0 %v4679_v27 }
0x28ed   :  { %4378 = vmatprep.subr.bf16.mxu0 %v4554_v0 }
0x28f0   :  { %4380 = vmatpush1.bf16.msra.mxu0 %v4683_v30 }
0x28f1   :  { %4381 = vmatprep.subr.bf16.mxu0 %v4554_v0 }
0x28f4   :  { %4383 = vmatpush1.bf16.msra.mxu0 %v4687_v33 }
0x28f5   :  { %4384 = vmatprep.subr.bf16.mxu0 %v4554_v0 }
0x28f8   :  { %4386 = vmatpush1.bf16.msra.mxu0 %v4691_v36 }
0x28f9   :  { %4387 = vmatprep.subr.bf16.mxu0 %v4554_v0 }
0x28fc   :  { %4389 = vmatpush1.bf16.msra.mxu0 %v4695_v40 }
0x28fd   :  { %4390 = vmatprep.subr.bf16.mxu0 %v4554_v0 }
0x2900   :  { %4392 = vmatpush1.bf16.msra.mxu0 %v4712_v3 }
0x2901   :  { %4393 = vmatprep.subr.bf16.mxu0 %v4554_v0 }
0x2904   :  { %4395 = vmatpush1.bf16.msra.mxu0 %v4716_v6 }
0x2905   :  { %4396 = vmatprep.subr.bf16.mxu0 %v4554_v0 }
0x2908   :  { %4398 = vmatpush1.bf16.msra.mxu0 %v4720_v10 }
0x2909   :  { %4399 = vmatprep.subr.bf16.mxu0 %v4554_v0 }
0x290c   :  { %4401 = vmatpush1.bf16.msra.mxu0 %v4724_v14 }
0x290d   :  { %2949 = vmatprep.subr.mxu0 %v4556_v1 }
0x2910   :  { %3096 = vmatpush1.msk.msra.mxu0 %vm426_vm4, %v5147_v7 }
0x29ba   :  { %v2887_v24 = vpop.f32.mrb[26].mxu0 }
0x29bb   :  { %v2891_v27 = vmul.f32 %v4984_v61, %v2887_v24  ;;  %v3849_v30 = vpop.f32.mrb[27].mxu0 }
0x29bd   :  { %v2892_v33 = vrot.slane %v2891_v27, 4 }
0x29bf   :  { %v2893_v36 = vadd.f32 %v2892_v33, %v2891_v27 }
0x29c1   :  { %v2894_v40 = vrot.slane %v2893_v36, 2 }
0x29c3   :  { %v2895_v3 = vadd.f32 %v2894_v40, %v2893_v36 }
0x29c5   :  { %v2896_v6 = vrot.slane %v2895_v3, 1 }
0x29c7   :  { %v2897_v48 = vadd.f32 %v2896_v6, %v2895_v3 }
0x29c9   :  { %v2898_v10 = vmul.f32 %v5023_v46, %v2897_v48 }
0x29cb   :  { %2974 = vmatmul.mubr.f32.vlgmr.msra.gmra.mrb[28].mxu0 %v2898_v10  ;;  %v3027_v15 = vmul.f32 %v3100_v31, %v2898_v10 }
0x29cd   :  { %v3028_v18 = vsel %vm204_vm1, %v3027_v15, 0.0 }
0x2a9e   :  { %v2975_v0 = vpop.f32.mrb[28].mxu0 }
0x2a9f   :  { %4516 = vtanh.f32 %v2975_v0  ;;  %v2977_v14 = vpop.f32.mrb[29].mxu0  ;;  %v3098_v7 = vmul.f32 -1.442695, %v2975_v0 }
0x2aa1   :  { %4518 = vpow2.f32 %v3098_v7 }
0x2aa9   :  { %v4517_v1 = vpop.eup %4516 }
0x2aaa   :  { %2988 = vrot.lane.b32.xlu1 %v4517_v1, %s4557_s29 }
0x2aab   :  { %v4519_v49 = vpop.eup %4518 }
0x2aac   :  { %v2982_v61 = vadd.f32 1.0, %v4519_v49 }
0x2aae   :  { %4520 = vrcp.f32 %v2982_v61 }
0x2ab8   :  { %v4521_v17 = vpop.eup %4520 }
0x2ab9   :  { %v2986_v46 = vmul.f32 %v4521_v17, %v5243_v12 }
0x2b1c   :  { %v2989_v11 = vpop.permute.xlu1 %2988 }
0x2b1d   :  { %v2991_v51 = vmul.f32 %v4521_v17, %v2989_v11 }
0x2b1f   :  { %2993 = vrot.lane.b32.xlu0 %v2991_v51, %s4558_s30 }
0x2b23   :  { %3011 = vrot.lane.b32.xlu0 %v3099_v52, %s4560_s1 }
0x2b91   :  { %v2994_v54 = vpop.permute.xlu0 %2993 }
0x2b92   :  { %v2996_v57 = vadd.f32 %v2994_v54, %v2986_v46 }
0x2b94   :  { %4522 = vtanh.f32 %v2996_v57 }
0x2b95   :  { %v3012_v4 = vpop.permute.xlu0 %3011 }
0x2b9e   :  { %v4523_v58 = vpop.eup %4522 }
0x2b9f   :  { %2999 = vrot.lane.b32.xlu1 %v4523_v58, %s4557_s29 }
0x2c11   :  { %v3000_v60 = vpop.permute.xlu1 %2999 }
0x2c12   :  { %v3002_v5 = vmul.f32 %v4521_v17, %v3000_v60 }
0x2c14   :  { %v3014_v8 = vmul.f32 %v3012_v4, %v3002_v5 }
0x2c16   :  { %3016 = vrot.lane.b32.xlu1 %v3014_v8, %s4558_s30 }
0x2c3a   :  { %3029 = vadd.xlane.f32.xlu1 %v3028_v18 }
0x2c88   :  { %v3017_v9 = vpop.permute.xlu1 %3016 }
0x2c89   :  { %v3020_v12 = vsel %vm3019_vm9, %v3017_v9, 0.0 }
0x2c8a   :  { %3021 = vadd.xlane.f32.xlu0 %v3020_v12 }
0x2cc7   :  { %v3030_v20 = vpop.xlane.xlu1 %3029 }
0x2d17   :  { %v3022_v41 = vpop.xlane.xlu0 %3021 }
0x2d18   :  { %v3031_v44 = vadd.f32 %v3030_v20, %v3022_v41 }
0x2d1a   :  { %v3036_v47 = vadd.f32 %v3101_v37, %v3031_v44 }
0x2d1c   :  { %3038 = vst.msk [vmem:[%s5316_s3] sm:$0xf] %vm3037_vm10, %v3036_v47 }
0x2d1d   :  { %3043 = vsyncpa [#allocation3], 1 }

</bundles_post_ra>
